<compile_context>
chip_gen: v5e
topology: v5e:2x2
jax: 0.10.0
libtpu: 0.0.40
codegen_flags: <defaults>
</compile_context>

<pallas_src>
import jax
import jax.numpy as jnp
from jax.experimental import pallas as pl
from jax.experimental.pallas import tpu as pltpu

EPS = 1e-5                    # PyTorch BatchNorm2d default eps
NEG_SLOPE = 0.2               # LeakyReLU negative slope
COMPUTE_DTYPE = jnp.bfloat16  # MXU operand / inter-layer storage dtype


# ----------------------------- Pallas kernels ------------------------------ #
def _matmulT_lrelu_kernel(w_ref, x_ref, o_ref):
    # h[c, m] = sum_k w[c, k] * x[k, m]   (channels on sublanes, pixels on lanes)
    h = jnp.dot(w_ref[...], x_ref[...], preferred_element_type=jnp.float32)
    o_ref[...] = jnp.maximum(h, NEG_SLOPE * h).astype(o_ref.dtype)


def _matmulT_bn_lrelu_kernel(w_ref, x_ref, g_ref, b_ref, o_ref):
    h = jnp.dot(w_ref[...], x_ref[...], preferred_element_type=jnp.float32)
    # Batch-stat BatchNorm over the pixel axis (lanes) -> XLU reductions.
    mean = jnp.mean(h, axis=1, keepdims=True)
    ex2 = jnp.mean(h * h, axis=1, keepdims=True)       # one-pass variance
    var = ex2 - mean * mean                            # biased, as PyTorch
    inv = jax.lax.rsqrt(var + EPS)
    hn = (h - mean) * (inv * g_ref[...]) + b_ref[...]
    o_ref[...] = jnp.maximum(hn, NEG_SLOPE * hn).astype(o_ref.dtype)


def _matmulT_bn_lrelu_head_kernel(w_ref, x_ref, g_ref, b_ref, w5_ref, o_ref):
    """L4 (Conv + BN + LeakyReLU) fused with the 8f->1 head conv.

    Grid axis runs over L4 channel blocks; the (1, B*16) partial accumulates
    in the resident output block, so the lane-sparse L4 activation never
    touches HBM and no separate head pallas_call is needed.
    """
    h = jnp.dot(w_ref[...], x_ref[...], preferred_element_type=jnp.float32)
    mean = jnp.mean(h, axis=1, keepdims=True)
    ex2 = jnp.mean(h * h, axis=1, keepdims=True)
    var = ex2 - mean * mean
    inv = jax.lax.rsqrt(var + EPS)
    hn = (h - mean) * (inv * g_ref[...]) + b_ref[...]
    a = jnp.maximum(hn, NEG_SLOPE * hn)                # f32 L4 activation
    partial = jnp.sum(a * w5_ref[...], axis=0, keepdims=True)   # (1, B*16)

    @pl.when(pl.program_id(0) == 0)
    def _():
        o_ref[...] = jnp.zeros_like(o_ref)

    o_ref[...] += partial


# --------------------------- tiling / VMEM budget --------------------------- #
def _ctile(c):
    # Prefer 256-row tiles (fills the 256x256 MXU on v6e/v7x), else 128
    # (v5e MXU / lane tile), else exact C (per-channel BN stays exact).
    if c % 256 == 0:
        return 256
    if c % 128 == 0:
        return 128
    return c


def _mtile(m):
    # Give the L1 grid >= 2 steps (pipelining + both TCs on v7x) when possible.
    for cand in (512, 256, 128):
        if m % cand == 0 and m // cand >= 2:
            return cand
    return m


def _vmem_limit(tc, k, mt, out_bytes, n_f32_tmp):
    # Double-buffered bf16 operand blocks + output block + f32 epilogue temps,
    # with 2x headroom; capped at v7x's 64 MiB physical VMEM.
    blocks = 2 * ((tc * k + k * mt) * 2 + tc * mt * out_bytes)
    temps = n_f32_tmp * tc * mt * 4
    need = 2 * (blocks + temps)
    return int(min(max(need, 32 * 2 ** 20), 64 * 2 ** 20))


# --------------------------- pallas_call wrappers --------------------------- #
def conv_lrelu(wT, xT):
    """L1: GEMM + LeakyReLU, bf16 out, (channel, M)-tiled parallel grid."""
    C, K = wT.shape
    M = xT.shape[1]
    tc, mt = _ctile(C), _mtile(M)
    return pl.pallas_call(
        _matmulT_lrelu_kernel,
        out_shape=jax.ShapeDtypeStruct((C, M), COMPUTE_DTYPE),
        grid_spec=pltpu.PrefetchScalarGridSpec(
            num_scalar_prefetch=0,
            grid=(C // tc, M // mt),
            in_specs=[pl.BlockSpec((tc, K), lambda i, j: (i, 0)),
                      pl.BlockSpec((K, mt), lambda i, j: (0, j))],
            out_specs=pl.BlockSpec((tc, mt), lambda i, j: (i, j)),
        ),
        compiler_params=pltpu.CompilerParams(
            dimension_semantics=("parallel", "parallel"),
            vmem_limit_bytes=_vmem_limit(tc, K, mt, 2, 1)),
    )(wT, xT)


def conv_bn_lrelu(wT, xT, gamma, beta):
    """L2/L3: GEMM + batch-stat BN + LeakyReLU, bf16 out, channel-tiled grid."""
    C, K = wT.shape
    M = xT.shape[1]
    tc = _ctile(C)
    return pl.pallas_call(
        _matmulT_bn_lrelu_kernel,
        out_shape=jax.ShapeDtypeStruct((C, M), COMPUTE_DTYPE),
        grid_spec=pltpu.PrefetchScalarGridSpec(
            num_scalar_prefetch=0,
            grid=(C // tc,),
            in_specs=[pl.BlockSpec((tc, K), lambda j: (j, 0)),
                      pl.BlockSpec((K, M), lambda j: (0, 0)),
                      pl.BlockSpec((tc, 1), lambda j: (j, 0)),
                      pl.BlockSpec((tc, 1), lambda j: (j, 0))],
            out_specs=pl.BlockSpec((tc, M), lambda j: (j, 0)),
        ),
        compiler_params=pltpu.CompilerParams(
            dimension_semantics=("parallel",),
            vmem_limit_bytes=_vmem_limit(tc, K, M, 2, 3)),
    )(wT, xT, gamma, beta)


def conv_bn_lrelu_head(wT, xT, gamma, beta, w5_tiled):
    """L4 + fused 8f->1 head conv; output is the (1, B*16) weighted partial."""
    C, K = wT.shape
    M = xT.shape[1]
    tc = _ctile(C)
    return pl.pallas_call(
        _matmulT_bn_lrelu_head_kernel,
        out_shape=jax.ShapeDtypeStruct((1, M), jnp.float32),
        grid_spec=pltpu.PrefetchScalarGridSpec(
            num_scalar_prefetch=0,
            grid=(C // tc,),
            in_specs=[pl.BlockSpec((tc, K), lambda j: (j, 0)),
                      pl.BlockSpec((K, M), lambda j: (0, 0)),
                      pl.BlockSpec((tc, 1), lambda j: (j, 0)),
                      pl.BlockSpec((tc, 1), lambda j: (j, 0)),
                      pl.BlockSpec((tc, M), lambda j: (j, 0))],
            out_specs=pl.BlockSpec((1, M), lambda j: (0, 0)),
        ),
        compiler_params=pltpu.CompilerParams(
            dimension_semantics=("arbitrary",),     # accumulator over channels
            vmem_limit_bytes=_vmem_limit(tc, K, M, 4, 4)),
    )(wT, xT, gamma, beta, w5_tiled)


# ------------------------------- JAX glue ---------------------------------- #
def _wT(w):
    """(Cout, Cin, k, k) -> (Cout, k*k*Cin) with K ordered (ky, kx, cin)."""
    return jnp.transpose(w, (0, 2, 3, 1)).reshape(w.shape[0], -1)


def _im2col_cbhw(x, *, k=4, stride=2, pad=1):
    """im2col on a channel-leading activation (no transposes).

    x: (C, B, H, W) -> xT: (k*k*C, B*OH*OW) with K ordered (ky, kx, c)
    and M ordered (b, oy, ox).  Matches `_wT` weight layout.
    """
    C, B, H, W = x.shape
    OH = (H + 2 * pad - k) // stride + 1
    OW = (W + 2 * pad - k) // stride + 1
    xp = jnp.pad(x, ((0, 0), (0, 0), (pad, pad), (pad, pad))) if pad else x
    cols = []
    for ky in range(k):
        for kx in range(k):
            cols.append(xp[:, :, ky:ky + stride * (OH - 1) + 1:stride,
                              kx:kx + stride * (OW - 1) + 1:stride])
    pat = jnp.stack(cols, axis=0)                      # (k*k, C, B, OH, OW)
    return pat.reshape(k * k * C, B * OH * OW), (B, OH, OW)


def init_params(key, channel_num, feature_num):
    f = feature_num
    ks = jax.random.split(key, 5)

    def conv_w(kk, cout, cin):
        return jax.random.normal(kk, (cout, cin, 4, 4), jnp.float32) / jnp.sqrt(cin * 16.0)

    p = {"w1": conv_w(ks[0], f, channel_num),
         "w2": conv_w(ks[1], 2 * f, f),
         "w3": conv_w(ks[2], 4 * f, 2 * f),
         "w4": conv_w(ks[3], 8 * f, 4 * f),
         "w5": conv_w(ks[4], 1, 8 * f)}
    for i, c in ((2, 2 * f), (3, 4 * f), (4, 8 * f)):
        p[f"g{i}"] = jnp.ones((c, 1), jnp.float32)     # BN gamma
        p[f"be{i}"] = jnp.zeros((c, 1), jnp.float32)   # BN beta
    return p


@jax.jit
def dc_discriminator_forward(params, x_nchw):
    cd = COMPUTE_DTYPE
    x = jnp.transpose(x_nchw, (1, 0, 2, 3)).astype(cd)     # (CH, B, H, W)

    # L1: Conv(ch -> f) + LeakyReLU(0.2)                   (no BN, no bias)
    xT, (B, OH, OW) = _im2col_cbhw(x)
    c1 = params["w1"].shape[0]
    y = conv_lrelu(_wT(params["w1"]).astype(cd), xT).reshape(c1, B, OH, OW)

    # L2, L3: Conv + BatchNorm2d (batch stats) + LeakyReLU(0.2)
    for i in (2, 3):
        xT, (B, OH, OW) = _im2col_cbhw(y)
        ci = params[f"w{i}"].shape[0]
        y = conv_bn_lrelu(_wT(params[f"w{i}"]).astype(cd), xT,
                          params[f"g{i}"], params[f"be{i}"]
                          ).reshape(ci, B, OH, OW)

    # L4: Conv + BN + LeakyReLU, fused with L5 head conv (8f -> 1, k4 s1 p0).
    xT, (B, OH4, OW4) = _im2col_cbhw(y)
    w4T = _wT(params["w4"]).astype(cd)
    c4 = params["w4"].shape[0]
    if (OH4, OW4) == (4, 4):                               # DCGAN 64x64 path
        w5p = params["w5"].reshape(c4, 16)                 # (8f, ky*4+kx) f32
        w5_tiled = jnp.tile(w5p, (1, B))                   # (8f, B*16), m = b*16+p
        colsum = conv_bn_lrelu_head(w4T, xT, params["g4"], params["be4"],
                                    w5_tiled)              # (1, B*16) f32
        out = jnp.sum(colsum.reshape(B, OH4 * OW4), axis=1)
        return out.reshape(B, 1, 1, 1)

    # General-spatial fallback: unfused L4; head conv as a plain XLA GEMM
    # (tiny GEMM -> not worth a pallas_call launch per the perf review).
    y4 = conv_bn_lrelu(w4T, xT, params["g4"], params["be4"]
                       ).reshape(c4, B, OH4, OW4)
    xT5, (B, OH5, OW5) = _im2col_cbhw(y4, stride=1, pad=0)
    o5 = jnp.dot(_wT(params["w5"]), xT5.astype(jnp.float32))
    return jnp.transpose(o5.reshape(1, B, OH5, OW5), (1, 0, 2, 3))


if __name__ == "__main__":
    B, CH, F, HW = 2, 3, 8, 64          # small DCGAN-discriminator shapes
    key = jax.random.PRNGKey(0)
    pkey, xkey = jax.random.split(key)
    params = init_params(pkey, CH, F)
    x = jax.random.normal(xkey, (B, CH, HW, HW), jnp.float32)

    out = dc_discriminator_forward(params, x)
    out = jax.block_until_ready(out)

    assert out.shape == (B, 1, 1, 1), out.shape
    assert bool(jnp.all(jnp.isfinite(out)))
    print("KERNEL_OK")
</pallas_src>

<mosaic_0001>
module attributes {stable_mosaic.version = 11 : i64} {
  func.func @_matmulT_lrelu_kernel(%arg0: i32, %arg1: i32, %arg2: memref<8x48xbf16, #tpu.memory_space<vmem>>, %arg3: memref<48x512xbf16, #tpu.memory_space<vmem>>, %arg4: memref<8x512xbf16, #tpu.memory_space<vmem>>) attributes {dimension_semantics = [#tpu.dimension_semantics<parallel>, #tpu.dimension_semantics<parallel>], iteration_bounds = array<i64: 1, 4>, scalar_prefetch = 0 : i64, scratch_operands = 0 : i64, tpu.core_type = #tpu.core_type<tc>, window_params = [{transform_indices = @transform_0, window_bounds = array<i64: 8, 48>}, {transform_indices = @transform_1, window_bounds = array<i64: 48, 512>}, {transform_indices = @transform_2, window_bounds = array<i64: 8, 512>}]} {
    %c0 = arith.constant 0 : index
    %c0_0 = arith.constant 0 : index
    %0 = vector.load %arg2[%c0, %c0_0] : memref<8x48xbf16, #tpu.memory_space<vmem>>, vector<8x48xbf16>
    %c0_1 = arith.constant 0 : index
    %c0_2 = arith.constant 0 : index
    %1 = vector.load %arg3[%c0_1, %c0_2] : memref<48x512xbf16, #tpu.memory_space<vmem>>, vector<48x512xbf16>
    %cst = arith.constant dense<0.000000e+00> : vector<8x512xf32>
    %2 = tpu.matmul %0, %1, %cst {dimension_numbers = #tpu.dot_dimension_numbers<[1], [0], [0], [1], [0, 0, 1, 1], [], []>} : vector<8x48xbf16>, vector<48x512xbf16>, vector<8x512xf32> -> vector<8x512xf32>
    %cst_3 = arith.constant 2.000000e-01 : f32
    %3 = vector.broadcast %cst_3 : f32 to vector<8x512xf32>
    %4 = arith.mulf %3, %2 : vector<8x512xf32>
    %5 = arith.maximumf %2, %4 : vector<8x512xf32>
    %6 = arith.truncf %5 : vector<8x512xf32> to vector<8x512xbf16>
    %c0_4 = arith.constant 0 : index
    %c0_5 = arith.constant 0 : index
    %7 = vector.load %arg4[%c0_4, %c0_5] : memref<8x512xbf16, #tpu.memory_space<vmem>>, vector<8x512xbf16>
    tpu.vector_store %arg4[%c0_4, %c0_5], %6 {strides = array<i32>} : memref<8x512xbf16, #tpu.memory_space<vmem>>, vector<8x512xbf16>,
    return
  }
  func.func @transform_0(%arg0: i32, %arg1: i32) -> (i32, i32) {
    %c0_i32 = arith.constant 0 : i32
    %c0_i32_0 = arith.constant 0 : i32
    return %arg0, %c0_i32 : i32, i32
  }
  func.func @transform_1(%arg0: i32, %arg1: i32) -> (i32, i32) {
    %c0_i32 = arith.constant 0 : i32
    %c0_i32_0 = arith.constant 0 : i32
    return %c0_i32, %arg1 : i32, i32
  }
  func.func @transform_2(%arg0: i32, %arg1: i32) -> (i32, i32) {
    %c0_i32 = arith.constant 0 : i32
    return %arg0, %arg1 : i32, i32
  }
}

module attributes {stable_mosaic.version = 11 : i64} {
  func.func @_matmulT_bn_lrelu_kernel(%arg0: i32, %arg1: memref<16x128xbf16, #tpu.memory_space<vmem>>, %arg2: memref<128x512xbf16, #tpu.memory_space<vmem>>, %arg3: memref<16x1xf32, #tpu.memory_space<vmem>>, %arg4: memref<16x1xf32, #tpu.memory_space<vmem>>, %arg5: memref<16x512xbf16, #tpu.memory_space<vmem>>) attributes {dimension_semantics = [#tpu.dimension_semantics<parallel>], iteration_bounds = array<i64: 1>, scalar_prefetch = 0 : i64, scratch_operands = 0 : i64, tpu.core_type = #tpu.core_type<tc>, window_params = [{transform_indices = @transform_0, window_bounds = array<i64: 16, 128>}, {pipeline_mode = #tpu.pipeline_mode<synchronous>, transform_indices = @transform_1, window_bounds = array<i64: 128, 512>}, {transform_indices = @transform_2, window_bounds = array<i64: 16, 1>}, {transform_indices = @transform_3, window_bounds = array<i64: 16, 1>}, {transform_indices = @transform_4, window_bounds = array<i64: 16, 512>}]} {
    %c0 = arith.constant 0 : index
    %c0_0 = arith.constant 0 : index
    %0 = vector.load %arg1[%c0, %c0_0] : memref<16x128xbf16, #tpu.memory_space<vmem>>, vector<16x128xbf16>
    %c0_1 = arith.constant 0 : index
    %c0_2 = arith.constant 0 : index
    %1 = vector.load %arg2[%c0_1, %c0_2] : memref<128x512xbf16, #tpu.memory_space<vmem>>, vector<128x512xbf16>
    %cst = arith.constant dense<0.000000e+00> : vector<16x512xf32>
    %2 = tpu.matmul %0, %1, %cst {dimension_numbers = #tpu.dot_dimension_numbers<[1], [0], [0], [1], [0, 0, 1, 1], [], []>} : vector<16x128xbf16>, vector<128x512xbf16>, vector<16x512xf32> -> vector<16x512xf32>
    %cst_3 = arith.constant dense<0.000000e+00> : vector<16xf32>
    %3 = vector.multi_reduction <add>, %2, %cst_3 [1] : vector<16x512xf32> to vector<16xf32>
    %4 = vector.shape_cast %3 : vector<16xf32> to vector<16x1xf32>
    %cst_4 = arith.constant 5.120000e+02 : f32
    %5 = vector.broadcast %cst_4 : f32 to vector<16x1xf32>
    %6 = arith.divf %4, %5 : vector<16x1xf32>
    %7 = arith.mulf %2, %2 : vector<16x512xf32>
    %cst_5 = arith.constant dense<0.000000e+00> : vector<16xf32>
    %8 = vector.multi_reduction <add>, %7, %cst_5 [1] : vector<16x512xf32> to vector<16xf32>
    %9 = vector.shape_cast %8 : vector<16xf32> to vector<16x1xf32>
    %cst_6 = arith.constant 5.120000e+02 : f32
    %10 = vector.broadcast %cst_6 : f32 to vector<16x1xf32>
    %11 = arith.divf %9, %10 : vector<16x1xf32>
    %12 = arith.mulf %6, %6 : vector<16x1xf32>
    %13 = arith.subf %11, %12 : vector<16x1xf32>
    %cst_7 = arith.constant 9.99999974E-6 : f32
    %14 = vector.broadcast %cst_7 : f32 to vector<16x1xf32>
    %15 = arith.addf %13, %14 : vector<16x1xf32>
    %16 = math.rsqrt %15 : vector<16x1xf32>
    %17 = vector.broadcast %6 : vector<16x1xf32> to vector<16x512xf32>
    %18 = arith.subf %2, %17 : vector<16x512xf32>
    %c0_8 = arith.constant 0 : index
    %c0_9 = arith.constant 0 : index
    %19 = vector.load %arg3[%c0_8, %c0_9] : memref<16x1xf32, #tpu.memory_space<vmem>>, vector<16x1xf32>
    %20 = arith.mulf %16, %19 : vector<16x1xf32>
    %21 = vector.broadcast %20 : vector<16x1xf32> to vector<16x512xf32>
    %22 = arith.mulf %18, %21 : vector<16x512xf32>
    %c0_10 = arith.constant 0 : index
    %c0_11 = arith.constant 0 : index
    %23 = vector.load %arg4[%c0_10, %c0_11] : memref<16x1xf32, #tpu.memory_space<vmem>>, vector<16x1xf32>
    %24 = vector.broadcast %23 : vector<16x1xf32> to vector<16x512xf32>
    %25 = arith.addf %22, %24 : vector<16x512xf32>
    %cst_12 = arith.constant 2.000000e-01 : f32
    %26 = vector.broadcast %cst_12 : f32 to vector<16x512xf32>
    %27 = arith.mulf %26, %25 : vector<16x512xf32>
    %28 = arith.maximumf %25, %27 : vector<16x512xf32>
    %29 = arith.truncf %28 : vector<16x512xf32> to vector<16x512xbf16>
    %c0_13 = arith.constant 0 : index
    %c0_14 = arith.constant 0 : index
    %30 = vector.load %arg5[%c0_13, %c0_14] : memref<16x512xbf16, #tpu.memory_space<vmem>>, vector<16x512xbf16>
    tpu.vector_store %arg5[%c0_13, %c0_14], %29 {strides = array<i32>} : memref<16x512xbf16, #tpu.memory_space<vmem>>, vector<16x512xbf16>,
    return
  }
  func.func @transform_0(%arg0: i32) -> (i32, i32) {
    %c0_i32 = arith.constant 0 : i32
    %c0_i32_0 = arith.constant 0 : i32
    return %arg0, %c0_i32 : i32, i32
  }
  func.func @transform_1(%arg0: i32) -> (i32, i32) {
    %c0_i32 = arith.constant 0 : i32
    %c0_i32_0 = arith.constant 0 : i32
    %c0_i32_1 = arith.constant 0 : i32
    return %c0_i32, %c0_i32_0 : i32, i32
  }
  func.func @transform_2(%arg0: i32) -> (i32, i32) {
    %c0_i32 = arith.constant 0 : i32
    %c0_i32_0 = arith.constant 0 : i32
    return %arg0, %c0_i32 : i32, i32
  }
  func.func @transform_3(%arg0: i32) -> (i32, i32) {
    %c0_i32 = arith.constant 0 : i32
    %c0_i32_0 = arith.constant 0 : i32
    return %arg0, %c0_i32 : i32, i32
  }
  func.func @transform_4(%arg0: i32) -> (i32, i32) {
    %c0_i32 = arith.constant 0 : i32
    %c0_i32_0 = arith.constant 0 : i32
    return %arg0, %c0_i32 : i32, i32
  }
}

module attributes {stable_mosaic.version = 11 : i64} {
  func.func @_matmulT_bn_lrelu_kernel(%arg0: i32, %arg1: memref<32x256xbf16, #tpu.memory_space<vmem>>, %arg2: memref<256x128xbf16, #tpu.memory_space<vmem>>, %arg3: memref<32x1xf32, #tpu.memory_space<vmem>>, %arg4: memref<32x1xf32, #tpu.memory_space<vmem>>, %arg5: memref<32x128xbf16, #tpu.memory_space<vmem>>) attributes {dimension_semantics = [#tpu.dimension_semantics<parallel>], iteration_bounds = array<i64: 1>, scalar_prefetch = 0 : i64, scratch_operands = 0 : i64, tpu.core_type = #tpu.core_type<tc>, window_params = [{transform_indices = @transform_0, window_bounds = array<i64: 32, 256>}, {pipeline_mode = #tpu.pipeline_mode<synchronous>, transform_indices = @transform_1, window_bounds = array<i64: 256, 128>}, {transform_indices = @transform_2, window_bounds = array<i64: 32, 1>}, {transform_indices = @transform_3, window_bounds = array<i64: 32, 1>}, {transform_indices = @transform_4, window_bounds = array<i64: 32, 128>}]} {
    %c0 = arith.constant 0 : index
    %c0_0 = arith.constant 0 : index
    %0 = vector.load %arg1[%c0, %c0_0] : memref<32x256xbf16, #tpu.memory_space<vmem>>, vector<32x256xbf16>
    %c0_1 = arith.constant 0 : index
    %c0_2 = arith.constant 0 : index
    %1 = vector.load %arg2[%c0_1, %c0_2] : memref<256x128xbf16, #tpu.memory_space<vmem>>, vector<256x128xbf16>
    %cst = arith.constant dense<0.000000e+00> : vector<32x128xf32>
    %2 = tpu.matmul %0, %1, %cst {dimension_numbers = #tpu.dot_dimension_numbers<[1], [0], [0], [1], [0, 0, 1, 1], [], []>} : vector<32x256xbf16>, vector<256x128xbf16>, vector<32x128xf32> -> vector<32x128xf32>
    %cst_3 = arith.constant dense<0.000000e+00> : vector<32xf32>
    %3 = vector.multi_reduction <add>, %2, %cst_3 [1] : vector<32x128xf32> to vector<32xf32>
    %4 = vector.shape_cast %3 : vector<32xf32> to vector<32x1xf32>
    %cst_4 = arith.constant 1.280000e+02 : f32
    %5 = vector.broadcast %cst_4 : f32 to vector<32x1xf32>
    %6 = arith.divf %4, %5 : vector<32x1xf32>
    %7 = arith.mulf %2, %2 : vector<32x128xf32>
    %cst_5 = arith.constant dense<0.000000e+00> : vector<32xf32>
    %8 = vector.multi_reduction <add>, %7, %cst_5 [1] : vector<32x128xf32> to vector<32xf32>
    %9 = vector.shape_cast %8 : vector<32xf32> to vector<32x1xf32>
    %cst_6 = arith.constant 1.280000e+02 : f32
    %10 = vector.broadcast %cst_6 : f32 to vector<32x1xf32>
    %11 = arith.divf %9, %10 : vector<32x1xf32>
    %12 = arith.mulf %6, %6 : vector<32x1xf32>
    %13 = arith.subf %11, %12 : vector<32x1xf32>
    %cst_7 = arith.constant 9.99999974E-6 : f32
    %14 = vector.broadcast %cst_7 : f32 to vector<32x1xf32>
    %15 = arith.addf %13, %14 : vector<32x1xf32>
    %16 = math.rsqrt %15 : vector<32x1xf32>
    %17 = vector.broadcast %6 : vector<32x1xf32> to vector<32x128xf32>
    %18 = arith.subf %2, %17 : vector<32x128xf32>
    %c0_8 = arith.constant 0 : index
    %c0_9 = arith.constant 0 : index
    %19 = vector.load %arg3[%c0_8, %c0_9] : memref<32x1xf32, #tpu.memory_space<vmem>>, vector<32x1xf32>
    %20 = arith.mulf %16, %19 : vector<32x1xf32>
    %21 = vector.broadcast %20 : vector<32x1xf32> to vector<32x128xf32>
    %22 = arith.mulf %18, %21 : vector<32x128xf32>
    %c0_10 = arith.constant 0 : index
    %c0_11 = arith.constant 0 : index
    %23 = vector.load %arg4[%c0_10, %c0_11] : memref<32x1xf32, #tpu.memory_space<vmem>>, vector<32x1xf32>
    %24 = vector.broadcast %23 : vector<32x1xf32> to vector<32x128xf32>
    %25 = arith.addf %22, %24 : vector<32x128xf32>
    %cst_12 = arith.constant 2.000000e-01 : f32
    %26 = vector.broadcast %cst_12 : f32 to vector<32x128xf32>
    %27 = arith.mulf %26, %25 : vector<32x128xf32>
    %28 = arith.maximumf %25, %27 : vector<32x128xf32>
    %29 = arith.truncf %28 : vector<32x128xf32> to vector<32x128xbf16>
    %c0_13 = arith.constant 0 : index
    %c0_14 = arith.constant 0 : index
    %30 = vector.load %arg5[%c0_13, %c0_14] : memref<32x128xbf16, #tpu.memory_space<vmem>>, vector<32x128xbf16>
    tpu.vector_store %arg5[%c0_13, %c0_14], %29 {strides = array<i32>} : memref<32x128xbf16, #tpu.memory_space<vmem>>, vector<32x128xbf16>,
    return
  }
  func.func @transform_0(%arg0: i32) -> (i32, i32) {
    %c0_i32 = arith.constant 0 : i32
    %c0_i32_0 = arith.constant 0 : i32
    return %arg0, %c0_i32 : i32, i32
  }
  func.func @transform_1(%arg0: i32) -> (i32, i32) {
    %c0_i32 = arith.constant 0 : i32
    %c0_i32_0 = arith.constant 0 : i32
    %c0_i32_1 = arith.constant 0 : i32
    return %c0_i32, %c0_i32_0 : i32, i32
  }
  func.func @transform_2(%arg0: i32) -> (i32, i32) {
    %c0_i32 = arith.constant 0 : i32
    %c0_i32_0 = arith.constant 0 : i32
    return %arg0, %c0_i32 : i32, i32
  }
  func.func @transform_3(%arg0: i32) -> (i32, i32) {
    %c0_i32 = arith.constant 0 : i32
    %c0_i32_0 = arith.constant 0 : i32
    return %arg0, %c0_i32 : i32, i32
  }
  func.func @transform_4(%arg0: i32) -> (i32, i32) {
    %c0_i32 = arith.constant 0 : i32
    %c0_i32_0 = arith.constant 0 : i32
    return %arg0, %c0_i32 : i32, i32
  }
}

module attributes {stable_mosaic.version = 11 : i64} {
  func.func @_matmulT_bn_lrelu_head_kernel(%arg0: i32, %arg1: memref<64x512xbf16, #tpu.memory_space<vmem>>, %arg2: memref<512x32xbf16, #tpu.memory_space<vmem>>, %arg3: memref<64x1xf32, #tpu.memory_space<vmem>>, %arg4: memref<64x1xf32, #tpu.memory_space<vmem>>, %arg5: memref<64x32xf32, #tpu.memory_space<vmem>>, %arg6: memref<1x32xf32, #tpu.memory_space<vmem>>) attributes {dimension_semantics = [#tpu.dimension_semantics<arbitrary>], iteration_bounds = array<i64: 1>, scalar_prefetch = 0 : i64, scratch_operands = 0 : i64, tpu.core_type = #tpu.core_type<tc>, window_params = [{transform_indices = @transform_0, window_bounds = array<i64: 64, 512>}, {pipeline_mode = #tpu.pipeline_mode<synchronous>, transform_indices = @transform_1, window_bounds = array<i64: 512, 32>}, {transform_indices = @transform_2, window_bounds = array<i64: 64, 1>}, {transform_indices = @transform_3, window_bounds = array<i64: 64, 1>}, {transform_indices = @transform_4, window_bounds = array<i64: 64, 32>}, {pipeline_mode = #tpu.pipeline_mode<synchronous>, transform_indices = @transform_5, window_bounds = array<i64: 1, 32>}]} {
    %c0 = arith.constant 0 : index
    %c0_0 = arith.constant 0 : index
    %0 = vector.load %arg1[%c0, %c0_0] : memref<64x512xbf16, #tpu.memory_space<vmem>>, vector<64x512xbf16>
    %c0_1 = arith.constant 0 : index
    %c0_2 = arith.constant 0 : index
    %1 = vector.load %arg2[%c0_1, %c0_2] : memref<512x32xbf16, #tpu.memory_space<vmem>>, vector<512x32xbf16>
    %cst = arith.constant dense<0.000000e+00> : vector<64x32xf32>
    %2 = tpu.matmul %0, %1, %cst {dimension_numbers = #tpu.dot_dimension_numbers<[1], [0], [0], [1], [0, 0, 1, 1], [], []>} : vector<64x512xbf16>, vector<512x32xbf16>, vector<64x32xf32> -> vector<64x32xf32>
    %cst_3 = arith.constant dense<0.000000e+00> : vector<64xf32>
    %3 = vector.multi_reduction <add>, %2, %cst_3 [1] : vector<64x32xf32> to vector<64xf32>
    %4 = vector.shape_cast %3 : vector<64xf32> to vector<64x1xf32>
    %cst_4 = arith.constant 3.200000e+01 : f32
    %5 = vector.broadcast %cst_4 : f32 to vector<64x1xf32>
    %6 = arith.divf %4, %5 : vector<64x1xf32>
    %7 = arith.mulf %2, %2 : vector<64x32xf32>
    %cst_5 = arith.constant dense<0.000000e+00> : vector<64xf32>
    %8 = vector.multi_reduction <add>, %7, %cst_5 [1] : vector<64x32xf32> to vector<64xf32>
    %9 = vector.shape_cast %8 : vector<64xf32> to vector<64x1xf32>
    %cst_6 = arith.constant 3.200000e+01 : f32
    %10 = vector.broadcast %cst_6 : f32 to vector<64x1xf32>
    %11 = arith.divf %9, %10 : vector<64x1xf32>
    %12 = arith.mulf %6, %6 : vector<64x1xf32>
    %13 = arith.subf %11, %12 : vector<64x1xf32>
    %cst_7 = arith.constant 9.99999974E-6 : f32
    %14 = vector.broadcast %cst_7 : f32 to vector<64x1xf32>
    %15 = arith.addf %13, %14 : vector<64x1xf32>
    %16 = math.rsqrt %15 : vector<64x1xf32>
    %17 = vector.broadcast %6 : vector<64x1xf32> to vector<64x32xf32>
    %18 = arith.subf %2, %17 : vector<64x32xf32>
    %c0_8 = arith.constant 0 : index
    %c0_9 = arith.constant 0 : index
    %19 = vector.load %arg3[%c0_8, %c0_9] : memref<64x1xf32, #tpu.memory_space<vmem>>, vector<64x1xf32>
    %20 = arith.mulf %16, %19 : vector<64x1xf32>
    %21 = vector.broadcast %20 : vector<64x1xf32> to vector<64x32xf32>
    %22 = arith.mulf %18, %21 : vector<64x32xf32>
    %c0_10 = arith.constant 0 : index
    %c0_11 = arith.constant 0 : index
    %23 = vector.load %arg4[%c0_10, %c0_11] : memref<64x1xf32, #tpu.memory_space<vmem>>, vector<64x1xf32>
    %24 = vector.broadcast %23 : vector<64x1xf32> to vector<64x32xf32>
    %25 = arith.addf %22, %24 : vector<64x32xf32>
    %cst_12 = arith.constant 2.000000e-01 : f32
    %26 = vector.broadcast %cst_12 : f32 to vector<64x32xf32>
    %27 = arith.mulf %26, %25 : vector<64x32xf32>
    %28 = arith.maximumf %25, %27 : vector<64x32xf32>
    %c0_13 = arith.constant 0 : index
    %c0_14 = arith.constant 0 : index
    %29 = vector.load %arg5[%c0_13, %c0_14] : memref<64x32xf32, #tpu.memory_space<vmem>>, vector<64x32xf32>
    %30 = arith.mulf %28, %29 : vector<64x32xf32>
    %cst_15 = arith.constant dense<0.000000e+00> : vector<32xf32>
    %31 = vector.multi_reduction <add>, %30, %cst_15 [0] : vector<64x32xf32> to vector<32xf32>
    %32 = vector.shape_cast %31 : vector<32xf32> to vector<1x32xf32>
    %c0_i32 = arith.constant 0 : i32
    %33 = arith.cmpi eq, %arg0, %c0_i32 : i32
    %34 = arith.extui %33 : i1 to i32
    %c0_i32_16 = arith.constant 0 : i32
    %35 = arith.cmpi ne, %34, %c0_i32_16 : i32
    scf.if %35 {
      %cst_21 = arith.constant 0.000000e+00 : f32
      %39 = vector.broadcast %cst_21 : f32 to vector<1x32xf32>
      %c0_22 = arith.constant 0 : index
      %c0_23 = arith.constant 0 : index
      %40 = vector.load %arg6[%c0_22, %c0_23] : memref<1x32xf32, #tpu.memory_space<vmem>>, vector<1x32xf32>
      tpu.vector_store %arg6[%c0_22, %c0_23], %39 {strides = array<i32>} : memref<1x32xf32, #tpu.memory_space<vmem>>, vector<1x32xf32>,
    } else {
    }
    %c0_17 = arith.constant 0 : index
    %c0_18 = arith.constant 0 : index
    %36 = vector.load %arg6[%c0_17, %c0_18] : memref<1x32xf32, #tpu.memory_space<vmem>>, vector<1x32xf32>
    %37 = arith.addf %36, %32 : vector<1x32xf32>
    %c0_19 = arith.constant 0 : index
    %c0_20 = arith.constant 0 : index
    %38 = vector.load %arg6[%c0_19, %c0_20] : memref<1x32xf32, #tpu.memory_space<vmem>>, vector<1x32xf32>
    tpu.vector_store %arg6[%c0_19, %c0_20], %37 {strides = array<i32>} : memref<1x32xf32, #tpu.memory_space<vmem>>, vector<1x32xf32>,
    return
  }
  func.func @transform_0(%arg0: i32) -> (i32, i32) {
    %c0_i32 = arith.constant 0 : i32
    %c0_i32_0 = arith.constant 0 : i32
    return %arg0, %c0_i32 : i32, i32
  }
  func.func @transform_1(%arg0: i32) -> (i32, i32) {
    %c0_i32 = arith.constant 0 : i32
    %c0_i32_0 = arith.constant 0 : i32
    %c0_i32_1 = arith.constant 0 : i32
    return %c0_i32, %c0_i32_0 : i32, i32
  }
  func.func @transform_2(%arg0: i32) -> (i32, i32) {
    %c0_i32 = arith.constant 0 : i32
    %c0_i32_0 = arith.constant 0 : i32
    return %arg0, %c0_i32 : i32, i32
  }
  func.func @transform_3(%arg0: i32) -> (i32, i32) {
    %c0_i32 = arith.constant 0 : i32
    %c0_i32_0 = arith.constant 0 : i32
    return %arg0, %c0_i32 : i32, i32
  }
  func.func @transform_4(%arg0: i32) -> (i32, i32) {
    %c0_i32 = arith.constant 0 : i32
    %c0_i32_0 = arith.constant 0 : i32
    return %arg0, %c0_i32 : i32, i32
  }
  func.func @transform_5(%arg0: i32) -> (i32, i32) {
    %c0_i32 = arith.constant 0 : i32
    %c0_i32_0 = arith.constant 0 : i32
    %c0_i32_1 = arith.constant 0 : i32
    return %c0_i32, %c0_i32_0 : i32, i32
  }
}

</mosaic_0001>

<bundles_post_ra>
// kernel: dc_discriminator_forward.4
= control target key start
LH: loop header
LB: loop body
LE: loop exit
PB: predicated region body
PF: predicated region fallthrough
CT: control target
= control target key end

     0   :  { %s645_s9 = smov 0   ;;  %s647_s10 = smov 0   ;;  %s739_s0 = inlined_call_operand.vmem [shape: bf16[8,48], index: 0, kind: input, shape index: {}]   ;;  %s740_s1 = inlined_call_operand.vmem [shape: bf16[48,2048], index: 1, kind: input, shape index: {}]   ;;  %s741_s2 = inlined_call_operand.vmem [shape: bf16[8,2048], index: 2, kind: output, shape index: {}]  }
   0x1   :  { %s649_s11 = smov 0   ;;  %s651_s12 = smov 0  }
   0x2   :  { %s653_s13 = smov 0  }
   0x3 LB: > { %s21_s14 = sadd.s32 1, %s624_s12  ;;  %p64_p1 = scmp.ne.s32.totalorder %s616_s10, %s612_s9  ;;  %s628_s13 = sphi %s653_s13, %s12_s13   ;;  %s624_s12 = sphi %s651_s12, %s745_s12   ;;  %s620_s11 = sphi %s649_s11, %s744_s11   ;;  %s616_s10 = sphi %s647_s10, %s743_s10   ;;  %s612_s9 = sphi %s645_s9, %s742_s9  }
   0x4   : > { %p22_p0 = scmp.ge.s32.totalorder %s21_s14, 4  ;;  %p65_p2 = scmp.eq.s32.totalorder %s628_s13, 0 }
   0x5   : > { %s57_s16 = sadd.s32 1, %s616_s10  ;;  %p475_p5 = scmp.ge.s32.totalorder %s628_s13, 4 }
   0x6   : > { %s747_s14 = smov (%p22_p0, %s21_s14), 0  ;;  %p66_p3 = por %p65_p2, %p64_p1 }
   0x7   : > { %s54_s15 = ssub.s32 %s624_s12, %s747_s14  ;;  %125 = sbr.rel (%p475_p5) target bundleno = 28 (0x1c), region = 20 }
   0x8   : > { %p55_p4 = scmp.eq.s32.totalorder %s54_s15, 0 }
   0xa   : > { %s680_s17 = scalar_select %p55_p4, %s616_s10, %s57_s16  }
   0xc   : > { %128 = sbr.rel (!%p66_p3) target bundleno = 28 (0x1c), region = 24  ;;  %s130_s18 = sand.u32 (%p66_p3), 1, %s616_s10  }
   0xd   : > { %s535_s19 = sshll.u32 (%p66_p3), %s624_s12, 4  ;;  %s548_s20 = smul.u32 (%p66_p3), 96, %s130_s18 }
   0xe   : > { %s135_s23 = scalar_lea.vmem (%p66_p3), %s740_s1, %s535_s19 }
   0xf   : > { %v148_v0 = vld [vmem:[%s135_s23] sm:$0xff] (%p66_p3)  ;;  %v150_v1 = vld [vmem:[%s135_s23 + $0x8] sm:$0xff] (%p66_p3)  ;;  %s132_s24 = scalar_lea.vmem (%p66_p3), [#allocation2], %s548_s20 }
  0x10   : > { %v152_v2 = vld [vmem:[%s135_s23 + $0x40] sm:$0xff] (%p66_p3)  ;;  %149 = vst [vmem:[%s132_s24] sm:$0xff] (%p66_p3), %v148_v0  ;;  %v154_v3 = vld [vmem:[%s135_s23 + $0x48] sm:$0xff] (%p66_p3) }
  0x11   : > { %151 = vst [vmem:[%s132_s24 + $0x8] sm:$0xff] %v150_v1  ;;  %v156_v4 = vld [vmem:[%s135_s23 + $0x80] sm:$0xff]  ;;  %v158_v5 = vld [vmem:[%s135_s23 + $0x88] sm:$0xff] }
  0x12   : > { %153 = vst [vmem:[%s132_s24 + $0x10] sm:$0xff] %v152_v2  ;;  %v160_v6 = vld [vmem:[%s135_s23 + $0xc0] sm:$0xff]  ;;  %v162_v7 = vld [vmem:[%s135_s23 + $0xc8] sm:$0xff] }
  0x13   : > { %155 = vst [vmem:[%s132_s24 + $0x18] sm:$0xff] %v154_v3  ;;  %v164_v8 = vld [vmem:[%s135_s23 + $0x100] sm:$0xff]  ;;  %v166_v9 = vld [vmem:[%s135_s23 + $0x108] sm:$0xff] }
  0x14   : > { %157 = vst [vmem:[%s132_s24 + $0x20] sm:$0xff] %v156_v4  ;;  %v168_v10 = vld [vmem:[%s135_s23 + $0x140] sm:$0xff]  ;;  %v170_v11 = vld [vmem:[%s135_s23 + $0x148] sm:$0xff] }
  0x15   : > { %159 = vst [vmem:[%s132_s24 + $0x28] sm:$0xff] %v158_v5 }
  0x16   : > { %161 = vst [vmem:[%s132_s24 + $0x30] sm:$0xff] %v160_v6 }
  0x17   : > { %163 = vst [vmem:[%s132_s24 + $0x38] sm:$0xff] %v162_v7 }
  0x18   : > { %165 = vst [vmem:[%s132_s24 + $0x40] sm:$0xff] %v164_v8 }
  0x19   : > { %167 = vst [vmem:[%s132_s24 + $0x48] sm:$0xff] %v166_v9 }
  0x1a   : > { %169 = vst [vmem:[%s132_s24 + $0x50] sm:$0xff] %v168_v10 }
  0x1b   : > { %171 = vst [vmem:[%s132_s24 + $0x58] sm:$0xff] %v170_v11 }
  0x1c PF: > { %p478_p6 = scmp.ge.s32.totalorder %s628_s13, 1  ;;  %p176_p7 = scmp.lt.s32.totalorder %s628_s13, 5 }
  0x1e   : > { %p177_p8 = pnand %p478_p6, %p176_p7 }
  0x1f   : > { %s183_s25 = sand.u32 (!%p177_p8), 1, %s612_s9   ;;  %s479_s30 = sshll.u32 (!%p177_p8), %s620_s11, 2 }
  0x20   : > { %180 = sbr.rel (%p177_p8) target bundleno = 193 (0xc1), region = 47  ;;  %p220_p9 = scmp.lt.s32.totalorder (!%p177_p8), %s479_s30, 15 }
  0x21   : > { %s549_s26 = smul.u32 (!%p177_p8), 96, %s183_s25 }
  0x23   : > { %s691_s27 = scalar_lea.vmem (!%p177_p8), [#allocation2], %s549_s26 }
  0x25   : > { %v515_v12 = vld [vmem:[%s691_s27 + $0x40] sm:$0xf]  ;;  %v546_v13 = vld [vmem:[%s691_s27 + $0x4c] sm:$0xf0]  ;;  %v544_v14 = vld [vmem:[%s691_s27 + $0x44] sm:$0xf] }
  0x26   : > { %v516_v15 = vor.u32 %v546_v13, %v515_v12  ;;  %v517_v16 = vld [vmem:[%s691_s27 + $0x50] sm:$0xf0]  ;;  %v523_v17 = vld [vmem:[%s691_s27 + $0x48] sm:$0xf]  ;;  %v547_v18 = vld [vmem:[%s691_s27 + $0x54] sm:$0xf0] }
  0x27   : > { %v520_v19 = vor.u32 %v544_v14, %v517_v16  ;;  %v524_v20 = vor.u32 %v547_v18, %v523_v17  ;;  %v545_v21 = vld [vmem:[%s691_s27 + $0x4c] sm:$0xf]  ;;  %v525_v22 = vld [vmem:[%s691_s27 + $0x58] sm:$0xf0]  ;;  %v499_v23 = vld [vmem:[%s691_s27 + $0x20] sm:$0xf] }
  0x28   : > { %310 = vmatpush.bf16.msra.mxu0 %v516_v15  ;;  %v528_v24 = vor.u32 %v545_v21, %v525_v22  ;;  %v542_v25 = vld [vmem:[%s691_s27 + $0x2c] sm:$0xf0]  ;;  %v540_v26 = vld [vmem:[%s691_s27 + $0x24] sm:$0xf]  ;;  %v501_v27 = vld [vmem:[%s691_s27 + $0x30] sm:$0xf0] }
  0x29   : > { %323 = vmatpush.bf16.msra.mxu1 %v520_v19  ;;  %336 = vmatpush.bf16.msra.mxu2 %v524_v20  ;;  %v500_v28 = vor.u32 %v542_v25, %v499_v23  ;;  %v504_v29 = vor.u32 %v540_v26, %v501_v27  ;;  %v507_v30 = vld [vmem:[%s691_s27 + $0x28] sm:$0xf]  ;;  %v543_v31 = vld [vmem:[%s691_s27 + $0x34] sm:$0xf0]  ;;  %v541_v32 = vld [vmem:[%s691_s27 + $0x2c] sm:$0xf] }
  0x2a   : > { %349 = vmatpush.bf16.msra.mxu3 %v528_v24  ;;  %v508_v33 = vor.u32 %v543_v31, %v507_v30  ;;  %v509_v34 = vld [vmem:[%s691_s27 + $0x38] sm:$0xf0]  ;;  %v483_v35 = vld [vmem:[%s691_s27] sm:$0xf]  ;;  %v538_v36 = vld [vmem:[%s691_s27 + $0xc] sm:$0xf0] }
  0x2b   : > { %v512_v37 = vor.u32 %v541_v32, %v509_v34  ;;  %v536_v38 = vld [vmem:[%s691_s27 + $0x4] sm:$0xf]  ;;  %v485_v39 = vld [vmem:[%s691_s27 + $0x10] sm:$0xf0]  ;;  %v491_v40 = vld [vmem:[%s691_s27 + $0x8] sm:$0xf]  ;;  %v484_v41 = vor.u32 %v538_v36, %v483_v35 }
  0x2c   : > { %311 = vmatpush.bf16.msra.mxu0 %v500_v28  ;;  %v539_v42 = vld [vmem:[%s691_s27 + $0x14] sm:$0xf0]  ;;  %v537_v43 = vld [vmem:[%s691_s27 + $0xc] sm:$0xf]  ;;  %v493_v44 = vld [vmem:[%s691_s27 + $0x18] sm:$0xf0]  ;;  %v488_v45 = vor.u32 %v536_v38, %v485_v39 }
  0x2d   : > { %324 = vmatpush.bf16.msra.mxu1 %v504_v29  ;;  %337 = vmatpush.bf16.msra.mxu2 %v508_v33  ;;  %v492_v46 = vor.u32 %v539_v42, %v491_v40  ;;  %v496_v47 = vor.u32 %v537_v43, %v493_v44  ;;  %v228_v48 = vld [vmem:[%s739_s0] sm:$0xf]  ;;  %vm301_vm0 = vcmask 392192   ;;  %s749_s30 = smov (!%p220_p9, %s479_s30), 15 }
  0x2e   : > { %350 = vmatpush.bf16.msra.mxu3 %v512_v37  ;;  %s480_s3 = sshll.u32 %s749_s30, 2 }
  0x2f   : > { %s225_s6 = scalar_lea.vmem %s741_s2, %s480_s3 }
  0x30   : > { %312 = vmatpush.bf16.msra.mxu0 %v484_v41 }
  0x31   : > { %325 = vmatpush.bf16.msra.mxu1 %v488_v45  ;;  %338 = vmatpush.bf16.msra.mxu2 %v492_v46 }
  0x32   : > { %351 = vmatpush.bf16.msra.mxu3 %v496_v47 }
  0x33   : > { %529 = vmatmul.msk.bf16.vlgmr.msra.gmra.mxu0 %vm301_vm0, %v228_v48 }
  0x34   : > { %530 = vmatmul.msk.bf16.vlgmr.msra.gmra.mxu1 %vm301_vm0, %v228_v48  ;;  %531 = vmatmul.msk.bf16.vlgmr.msra.gmra.mxu2 %vm301_vm0, %v228_v48 }
  0x35   : > { %532 = vmatmul.msk.bf16.vlgmr.msra.gmra.mxu3 %vm301_vm0, %v228_v48 }
  0xb0   : > { %v314_v49 = vpop.f32.mrf.mxu0 }
  0xb1   : > { %v357_v50 = vmul.f32 0.2, %v314_v49  ;;  %v327_v51 = vpop.f32.mrf.mxu1 }
  0xb2   : > { %v358_v52 = vmul.f32 0.2, %v327_v51 }
  0xb3   : > { %v361_v53 = vmax.f32 %v314_v49, %v357_v50 }
  0xb4   : > { %v362_v54 = vmax.f32 %v327_v51, %v358_v52 }
  0xb6   : > { %v365_v55 = vpack.c.bf16 %v362_v54, %v361_v53 }
  0xb7   : > { %v340_v56 = vpop.f32.mrf.mxu2 }
  0xb8   : > { %367 = vst [vmem:[%s225_s6] sm:$0xff] %v365_v55  ;;  %v359_v57 = vmul.f32 0.2, %v340_v56  ;;  %v353_v58 = vpop.f32.mrf.mxu3  ;;  %v316_v59 = vpop.f32.mrf.mxu0 }
  0xb9   : > { %v360_v60 = vmul.f32 0.2, %v353_v58  ;;  %v329_v61 = vpop.f32.mrf.mxu1 }
  0xba   : > { %v363_v62 = vmax.f32 %v340_v56, %v359_v57 }
  0xbb   : > { %v364_v63 = vmax.f32 %v353_v58, %v360_v60 }
  0xbd   : > { %v366_v0 = vpack.c.bf16 %v364_v63, %v363_v62 }
  0xbf   : > { %368 = vst [vmem:[%s225_s6 + $0x8] sm:$0xff] %v366_v0  ;;  %v342_v1 = vpop.f32.mrf.mxu2 }
  0xc0   : > { %v355_v2 = vpop.f32.mrf.mxu3 }
  0xc1 PF: > { %s12_s13 = sadd.s32 1, %s628_s13   ;;  %s742_s9 = smov %s616_s10 }
  0xc2   : > { %p9_p10 = scmp.ge.s32.totalorder %s12_s13, 6   ;;  %s743_s10 = smov %s680_s17 }
  0xc3   : > { %s744_s11 = smov %s624_s12  ;;  %s745_s12 = smov %s747_s14 }
  0xc4   :  { %11 = sbr.rel (!%p9_p10) target bundleno = 3 (0x3), region = 89 }

// kernel: dc_discriminator_forward.5
= control target key start
LH: loop header
LB: loop body
LE: loop exit
PB: predicated region body
PF: predicated region fallthrough
CT: control target
= control target key end

     0   :  { %s894_s1 = inlined_call_operand.vmem [shape: bf16[128,512], index: 1, kind: input, shape index: {}]   ;;  %s895_s0 = inlined_call_operand.vmem [shape: bf16[16,128], index: 0, kind: input, shape index: {}]   ;;  %s896_s3 = inlined_call_operand.vmem [shape: f32[16,1], index: 3, kind: input, shape index: {}]   ;;  %s897_s2 = inlined_call_operand.vmem [shape: f32[16,1], index: 2, kind: input, shape index: {}]   ;;  %s898_s4 = inlined_call_operand.vmem [shape: bf16[16,512], index: 4, kind: output, shape index: {}]  }
   0x1   :  { %v534_v0 = vld [vmem:[%s894_s1 + $0xe0] sm:$0xf]  ;;  %v579_v1 = vld [vmem:[%s894_s1 + $0xec] sm:$0xf0]  ;;  %v577_v2 = vld [vmem:[%s894_s1 + $0xe4] sm:$0xf] }
   0x2   :  { %v535_v3 = vor.u32 %v579_v1, %v534_v0  ;;  %v536_v4 = vld [vmem:[%s894_s1 + $0xf0] sm:$0xf0]  ;;  %v542_v5 = vld [vmem:[%s894_s1 + $0xe8] sm:$0xf]  ;;  %v580_v6 = vld [vmem:[%s894_s1 + $0xf4] sm:$0xf0] }
   0x3   :  { %v539_v7 = vor.u32 %v577_v2, %v536_v4  ;;  %v543_v8 = vor.u32 %v580_v6, %v542_v5  ;;  %v578_v9 = vld [vmem:[%s894_s1 + $0xec] sm:$0xf]  ;;  %v544_v10 = vld [vmem:[%s894_s1 + $0xf8] sm:$0xf0]  ;;  %v518_v11 = vld [vmem:[%s894_s1 + $0xc0] sm:$0xf] }
   0x4   :  { %217 = vmatpush.bf16.msra.mxu0 %v535_v3  ;;  %v547_v12 = vor.u32 %v578_v9, %v544_v10  ;;  %v575_v13 = vld [vmem:[%s894_s1 + $0xcc] sm:$0xf0]  ;;  %v573_v14 = vld [vmem:[%s894_s1 + $0xc4] sm:$0xf]  ;;  %v520_v15 = vld [vmem:[%s894_s1 + $0xd0] sm:$0xf0] }
   0x5   :  { %231 = vmatpush.bf16.msra.mxu1 %v539_v7  ;;  %245 = vmatpush.bf16.msra.mxu2 %v543_v8  ;;  %v519_v16 = vor.u32 %v575_v13, %v518_v11  ;;  %v523_v17 = vor.u32 %v573_v14, %v520_v15  ;;  %v526_v18 = vld [vmem:[%s894_s1 + $0xc8] sm:$0xf]  ;;  %v576_v19 = vld [vmem:[%s894_s1 + $0xd4] sm:$0xf0]  ;;  %v574_v20 = vld [vmem:[%s894_s1 + $0xcc] sm:$0xf] }
   0x6   :  { %259 = vmatpush.bf16.msra.mxu3 %v547_v12  ;;  %v527_v21 = vor.u32 %v576_v19, %v526_v18  ;;  %v528_v22 = vld [vmem:[%s894_s1 + $0xd8] sm:$0xf0]  ;;  %v502_v23 = vld [vmem:[%s894_s1 + $0xa0] sm:$0xf]  ;;  %v571_v24 = vld [vmem:[%s894_s1 + $0xac] sm:$0xf0] }
   0x7   :  { %v531_v25 = vor.u32 %v574_v20, %v528_v22  ;;  %v569_v26 = vld [vmem:[%s894_s1 + $0xa4] sm:$0xf]  ;;  %v504_v27 = vld [vmem:[%s894_s1 + $0xb0] sm:$0xf0]  ;;  %v510_v28 = vld [vmem:[%s894_s1 + $0xa8] sm:$0xf]  ;;  %v503_v29 = vor.u32 %v571_v24, %v502_v23 }
   0x8   :  { %218 = vmatpush.bf16.msra.mxu0 %v519_v16  ;;  %v572_v30 = vld [vmem:[%s894_s1 + $0xb4] sm:$0xf0]  ;;  %v570_v31 = vld [vmem:[%s894_s1 + $0xac] sm:$0xf]  ;;  %v512_v32 = vld [vmem:[%s894_s1 + $0xb8] sm:$0xf0]  ;;  %v507_v33 = vor.u32 %v569_v26, %v504_v27 }
   0x9   :  { %232 = vmatpush.bf16.msra.mxu1 %v523_v17  ;;  %246 = vmatpush.bf16.msra.mxu2 %v527_v21  ;;  %v511_v34 = vor.u32 %v572_v30, %v510_v28  ;;  %v486_v35 = vld [vmem:[%s894_s1 + $0x80] sm:$0xf]  ;;  %v567_v36 = vld [vmem:[%s894_s1 + $0x8c] sm:$0xf0]  ;;  %v565_v37 = vld [vmem:[%s894_s1 + $0x84] sm:$0xf]  ;;  %v515_v38 = vor.u32 %v570_v31, %v512_v32 }
   0xa   :  { %260 = vmatpush.bf16.msra.mxu3 %v531_v25  ;;  %v488_v39 = vld [vmem:[%s894_s1 + $0x90] sm:$0xf0]  ;;  %v494_v40 = vld [vmem:[%s894_s1 + $0x88] sm:$0xf]  ;;  %v568_v41 = vld [vmem:[%s894_s1 + $0x94] sm:$0xf0]  ;;  %v487_v44 = vor.u32 %v567_v36, %v486_v35 }
   0xb   :  { %v566_v42 = vld [vmem:[%s894_s1 + $0x8c] sm:$0xf]  ;;  %v496_v43 = vld [vmem:[%s894_s1 + $0x98] sm:$0xf0]  ;;  %v491_v45 = vor.u32 %v565_v37, %v488_v39  ;;  %v495_v46 = vor.u32 %v568_v41, %v494_v40  ;;  %v470_v47 = vld [vmem:[%s894_s1 + $0x60] sm:$0xf] }
   0xc   :  { %219 = vmatpush.bf16.msra.mxu0 %v503_v29  ;;  %v563_v48 = vld [vmem:[%s894_s1 + $0x6c] sm:$0xf0]  ;;  %v561_v49 = vld [vmem:[%s894_s1 + $0x64] sm:$0xf]  ;;  %v499_v50 = vor.u32 %v566_v42, %v496_v43  ;;  %v472_v51 = vld [vmem:[%s894_s1 + $0x70] sm:$0xf0] }
   0xd   :  { %233 = vmatpush.bf16.msra.mxu1 %v507_v33  ;;  %247 = vmatpush.bf16.msra.mxu2 %v511_v34  ;;  %v478_v52 = vld [vmem:[%s894_s1 + $0x68] sm:$0xf]  ;;  %v564_v53 = vld [vmem:[%s894_s1 + $0x74] sm:$0xf0]  ;;  %v562_v54 = vld [vmem:[%s894_s1 + $0x6c] sm:$0xf]  ;;  %v471_v56 = vor.u32 %v563_v48, %v470_v47  ;;  %v475_v57 = vor.u32 %v561_v49, %v472_v51 }
   0xe   :  { %261 = vmatpush.bf16.msra.mxu3 %v515_v38  ;;  %v480_v55 = vld [vmem:[%s894_s1 + $0x78] sm:$0xf0]  ;;  %v479_v58 = vor.u32 %v564_v53, %v478_v52  ;;  %v454_v59 = vld [vmem:[%s894_s1 + $0x40] sm:$0xf]  ;;  %v559_v60 = vld [vmem:[%s894_s1 + $0x4c] sm:$0xf0] }
   0xf   :  { %v557_v61 = vld [vmem:[%s894_s1 + $0x44] sm:$0xf]  ;;  %v483_v62 = vor.u32 %v562_v54, %v480_v55  ;;  %v456_v63 = vld [vmem:[%s894_s1 + $0x50] sm:$0xf0]  ;;  %v462_v0 = vld [vmem:[%s894_s1 + $0x48] sm:$0xf]  ;;  %v455_v4 = vor.u32 %v559_v60, %v454_v59 }
  0x10   :  { %220 = vmatpush.bf16.msra.mxu0 %v487_v44  ;;  %v560_v1 = vld [vmem:[%s894_s1 + $0x54] sm:$0xf0]  ;;  %v558_v2 = vld [vmem:[%s894_s1 + $0x4c] sm:$0xf]  ;;  %v464_v3 = vld [vmem:[%s894_s1 + $0x58] sm:$0xf0]  ;;  %v459_v5 = vor.u32 %v557_v61, %v456_v63 }
  0x11   :  { %234 = vmatpush.bf16.msra.mxu1 %v491_v45  ;;  %248 = vmatpush.bf16.msra.mxu2 %v495_v46  ;;  %v463_v6 = vor.u32 %v560_v1, %v462_v0  ;;  %v438_v7 = vld [vmem:[%s894_s1 + $0x20] sm:$0xf]  ;;  %v555_v8 = vld [vmem:[%s894_s1 + $0x2c] sm:$0xf0]  ;;  %v553_v9 = vld [vmem:[%s894_s1 + $0x24] sm:$0xf]  ;;  %v467_v10 = vor.u32 %v558_v2, %v464_v3 }
  0x12   :  { %262 = vmatpush.bf16.msra.mxu3 %v499_v50  ;;  %v440_v11 = vld [vmem:[%s894_s1 + $0x30] sm:$0xf0]  ;;  %v446_v12 = vld [vmem:[%s894_s1 + $0x28] sm:$0xf]  ;;  %v556_v13 = vld [vmem:[%s894_s1 + $0x34] sm:$0xf0]  ;;  %v439_v16 = vor.u32 %v555_v8, %v438_v7 }
  0x13   :  { %v554_v14 = vld [vmem:[%s894_s1 + $0x2c] sm:$0xf]  ;;  %v448_v15 = vld [vmem:[%s894_s1 + $0x38] sm:$0xf0]  ;;  %v443_v17 = vor.u32 %v553_v9, %v440_v11  ;;  %v447_v18 = vor.u32 %v556_v13, %v446_v12  ;;  %v422_v19 = vld [vmem:[%s894_s1] sm:$0xf] }
  0x14   :  { %221 = vmatpush.bf16.msra.mxu0 %v471_v56  ;;  %v551_v20 = vld [vmem:[%s894_s1 + $0xc] sm:$0xf0]  ;;  %v549_v21 = vld [vmem:[%s894_s1 + $0x4] sm:$0xf]  ;;  %v451_v22 = vor.u32 %v554_v14, %v448_v15  ;;  %v424_v23 = vld [vmem:[%s894_s1 + $0x10] sm:$0xf0] }
  0x15   :  { %235 = vmatpush.bf16.msra.mxu1 %v475_v57  ;;  %249 = vmatpush.bf16.msra.mxu2 %v479_v58  ;;  %v430_v24 = vld [vmem:[%s894_s1 + $0x8] sm:$0xf]  ;;  %v552_v25 = vld [vmem:[%s894_s1 + $0x14] sm:$0xf0]  ;;  %v550_v26 = vld [vmem:[%s894_s1 + $0xc] sm:$0xf]  ;;  %v423_v28 = vor.u32 %v551_v20, %v422_v19  ;;  %v427_v29 = vor.u32 %v549_v21, %v424_v23 }
  0x16   :  { %263 = vmatpush.bf16.msra.mxu3 %v483_v62  ;;  %v432_v27 = vld [vmem:[%s894_s1 + $0x18] sm:$0xf0]  ;;  %v431_v30 = vor.u32 %v552_v25, %v430_v24  ;;  %v548_v32 = vld [vmem:[%s895_s0] sm:$0xff]  ;;  %v592_v61 = vmov 512.0   ;;  %v593_v62 = vmov 0   ;;  %v369_v2 = vld [vmem:[%s896_s3 + $0x8] sm:$0xff] }
  0x17   :  { %v435_v31 = vor.u32 %v550_v26, %v432_v27  ;;  %586 = vrcp.f32 %v592_v61  ;;  %584 = vset.pattern.permute.xlu0 %v593_v62  ;;  %v368_v63 = vld [vmem:[%s896_s3] sm:$0xff]  ;;  %585 = vset.pattern.permute.xlu1 %v593_v62 }
  0x18   :  { %222 = vmatpush.bf16.msra.mxu0 %v455_v4  ;;  %583 = vset.pattern.permute.xlu2 %v593_v62 }
  0x19   :  { %236 = vmatpush.bf16.msra.mxu1 %v459_v5  ;;  %250 = vmatpush.bf16.msra.mxu2 %v463_v6 }
  0x1a   :  { %264 = vmatpush.bf16.msra.mxu3 %v467_v10 }
  0x1c   :  { %223 = vmatpush.bf16.msra.mxu0 %v439_v16 }
  0x1d   :  { %237 = vmatpush.bf16.msra.mxu1 %v443_v17  ;;  %251 = vmatpush.bf16.msra.mxu2 %v447_v18  ;;  %v587_v0 = vpop.eup %586 }
  0x1e   :  { %265 = vmatpush.bf16.msra.mxu3 %v451_v22  ;;  %v284_v1 = vmul.f32 512.0, %v587_v0  ;;  %vm288_vm0 = vweird.f32 %v587_v0 }
  0x20   :  { %224 = vmatpush.bf16.msra.mxu0 %v423_v28  ;;  %v285_v3 = vsub.f32 1.0, %v284_v1 }
  0x21   :  { %238 = vmatpush.bf16.msra.mxu1 %v427_v29  ;;  %252 = vmatpush.bf16.msra.mxu2 %v431_v30  ;;  %v346_v29 = vld [vmem:[%s897_s2] sm:$0xff] }
  0x22   :  { %266 = vmatpush.bf16.msra.mxu3 %v435_v31  ;;  %v286_v4 = vmul.f32 %v587_v0, %v285_v3 }
  0x23   :  { %225 = vmatmul.bf16.vlgmr.msra.gmra.mxu0 %v548_v32 }
  0x24   :  { %239 = vmatmul.bf16.vlgmr.msra.gmra.mxu1 %v548_v32  ;;  %253 = vmatmul.bf16.vlgmr.msra.gmra.mxu2 %v548_v32  ;;  %v287_v5 = vadd.f32 %v587_v0, %v286_v4 }
  0x25   :  { %267 = vmatmul.bf16.vlgmr.msra.gmra.mxu3 %v548_v32 }
  0x26   :  { %v289_v6 = vsel %vm288_vm0, %v587_v0, %v287_v5 }
  0xa0   :  { %v814_v33 = vpop.f32.mrf.mxu0 }
  0xa1   :  { %v816_v34 = vpop.f32.mrf.mxu1  ;;  %v292_v35 = vmul.f32 %v814_v33, %v814_v33 }
  0xa2   :  { %v293_v36 = vmul.f32 %v816_v34, %v816_v34  ;;  %v273_v37 = vadd.f32 %v816_v34, %v814_v33 }
  0xa4   :  { %v300_v38 = vadd.f32 %v293_v36, %v292_v35 }
  0xa7   :  { %v824_v39 = vpop.f32.mrf.mxu2 }
  0xa8   :  { %v294_v40 = vmul.f32 %v824_v39, %v824_v39  ;;  %v828_v41 = vpop.f32.mrf.mxu3  ;;  %v274_v42 = vadd.f32 %v273_v37, %v824_v39  ;;  %v831_v43 = vpop.f32.mrf.mxu0  ;;  %v347_v37 = vld [vmem:[%s897_s2 + $0x8] sm:$0xff] }
  0xa9   :  { %v833_v44 = vpop.f32.mrf.mxu1  ;;  %v295_v45 = vmul.f32 %v828_v41, %v828_v41  ;;  %v296_v48 = vmul.f32 %v831_v43, %v831_v43 }
  0xaa   :  { %v275_v46 = vadd.f32 %v274_v42, %v828_v41  ;;  %v301_v47 = vadd.f32 %v300_v38, %v294_v40  ;;  %v297_v49 = vmul.f32 %v833_v44, %v833_v44  ;;  %v278_v51 = vadd.f32 %v833_v44, %v831_v43 }
  0xac   :  { %276 = vadd.xlane.f32.xlu0 %v275_v46  ;;  %v302_v50 = vadd.f32 %v301_v47, %v295_v45  ;;  %v305_v53 = vadd.f32 %v297_v49, %v296_v48 }
  0xae   :  { %303 = vadd.xlane.f32.xlu1 %v302_v50 }
  0xaf   :  { %v844_v52 = vpop.f32.mrf.mxu2 }
  0xb0   :  { %v279_v54 = vadd.f32 %v278_v51, %v844_v52  ;;  %v298_v55 = vmul.f32 %v844_v52, %v844_v52  ;;  %v849_v56 = vpop.f32.mrf.mxu3 }
  0xb1   :  { %v299_v57 = vmul.f32 %v849_v56, %v849_v56 }
  0xb2   :  { %v280_v58 = vadd.f32 %v279_v54, %v849_v56  ;;  %v306_v59 = vadd.f32 %v305_v53, %v298_v55 }
  0xb4   :  { %281 = vadd.xlane.f32.xlu0 %v280_v58  ;;  %v307_v60 = vadd.f32 %v306_v59, %v299_v57 }
  0xb6   :  { %308 = vadd.xlane.f32.xlu1 %v307_v60 }
  0xc8   :  { %372 = vperm.xlu0 %584, %v368_v63  }
  0xcf   :  { %377 = vperm.xlu1 %585, %v369_v2  }
 0x11f   :  { %v277_v7 = vpop.xlane.xlu0 %276 }
 0x120   :  { %v290_v8 = vmul.f32 %v289_v6, %v277_v7 }
 0x121   :  { %v304_v9 = vpop.xlane.xlu1 %303 }
 0x122   :  { %v310_v10 = vmul.f32 %v304_v9, %v289_v6  ;;  %v312_v11 = vmul.f32 %v290_v8, %v290_v8  ;;  %v338_v45 = vsub.f32 %v814_v33, %v290_v8  ;;  %v339_v46 = vsub.f32 %v816_v34, %v290_v8 }
 0x123   :  { %v340_v47 = vsub.f32 %v824_v39, %v290_v8  ;;  %v341_v48 = vsub.f32 %v828_v41, %v290_v8 }
 0x124   :  { %v314_v12 = vsub.f32 %v310_v10, %v312_v11 }
 0x126   :  { %v316_v13 = vadd.f32 1e-05, %v314_v12 }
 0x127   :  { %v282_v14 = vpop.xlane.xlu0 %281 }
 0x128   :  { %588 = vrsqrt.f32 %v316_v13  ;;  %v860_v15 = vmul.f32 %v289_v6, %v282_v14  ;;  %vm324_vm2 = vweird.f32 %v316_v13 }
 0x129   :  { %v309_v16 = vpop.xlane.xlu1 %308 }
 0x12a   :  { %v311_v17 = vmul.f32 %v309_v16, %v289_v6  ;;  %v313_v18 = vmul.f32 %v860_v15, %v860_v15  ;;  %v342_v34 = vsub.f32 %v831_v43, %v860_v15  ;;  %v343_v39 = vsub.f32 %v833_v44, %v860_v15 }
 0x12b   :  { %v344_v2 = vsub.f32 %v844_v52, %v860_v15  ;;  %v345_v4 = vsub.f32 %v849_v56, %v860_v15 }
 0x12c   :  { %v315_v19 = vsub.f32 %v311_v17, %v313_v18 }
 0x12e   :  { %v589_v20 = vpop.eup %588  ;;  %v317_v21 = vadd.f32 1e-05, %v315_v19 }
 0x12f   :  { %v319_v22 = vmul.f32 %v589_v20, %v316_v13  ;;  %vm325_vm1 = vweird.f32 %v589_v20 }
 0x130   :  { %590 = vrsqrt.f32 %v317_v21  ;;  %vm326_vm3 = vmor %vm324_vm2, %vm325_vm1  ;;  %vm334_vm5 = vweird.f32 %v317_v21 }
 0x131   :  { %v320_v23 = vmul.f32 %v589_v20, %v319_v22 }
 0x133   :  { %v321_v24 = vmul.f32 0.5, %v320_v23 }
 0x135   :  { %v322_v25 = vsub.f32 1.5, %v321_v24 }
 0x136   :  { %v591_v26 = vpop.eup %590 }
 0x137   :  { %v329_v27 = vmul.f32 %v591_v26, %v317_v21  ;;  %v323_v28 = vmul.f32 %v589_v20, %v322_v25  ;;  %vm335_vm4 = vweird.f32 %v591_v26 }
 0x138   :  { %vm336_vm6 = vmor %vm334_vm5, %vm335_vm4 }
 0x139   :  { %v330_v30 = vmul.f32 %v591_v26, %v329_v27  ;;  %v327_v31 = vsel %vm326_vm3, %v589_v20, %v323_v28 }
 0x13a   :  { %v348_v32 = vmul.f32 %v346_v29, %v327_v31  ;;  %v373_v50 = vpop.permute.xlu0 %372 }
 0x13b   :  { %v331_v35 = vmul.f32 0.5, %v330_v30 }
 0x13c   :  { %352 = vperm.xlu2 %583, %v348_v32  }
 0x13d   :  { %v332_v36 = vsub.f32 1.5, %v331_v35 }
 0x13f   :  { %v333_v38 = vmul.f32 %v591_v26, %v332_v36 }
 0x141   :  { %v337_v40 = vsel %vm336_vm6, %v591_v26, %v333_v38  ;;  %v378_v6 = vpop.permute.xlu1 %377 }
 0x142   :  { %v349_v42 = vmul.f32 %v347_v37, %v337_v40 }
 0x144   :  { %357 = vperm.xlu2 %583, %v349_v42  }
 0x196   :  { %v353_v49 = vpop.permute.xlu2 %352 }
 0x197   :  { %v360_v51 = vmul.f32 %v353_v49, %v338_v45  ;;  %v361_v53 = vmul.f32 %v353_v49, %v339_v46  ;;  %v362_v54 = vmul.f32 %v353_v49, %v340_v47  ;;  %v363_v55 = vmul.f32 %v353_v49, %v341_v48 }
 0x199   :  { %v380_v57 = vadd.f32 %v373_v50, %v360_v51  ;;  %v381_v58 = vadd.f32 %v373_v50, %v361_v53  ;;  %v382_v59 = vadd.f32 %v373_v50, %v362_v54  ;;  %v383_v60 = vadd.f32 %v373_v50, %v363_v55 }
 0x19b   :  { %v388_v61 = vmul.f32 0.2, %v380_v57  ;;  %v389_v62 = vmul.f32 0.2, %v381_v58  ;;  %v390_v63 = vmul.f32 0.2, %v382_v59 }
 0x19c   :  { %v391_v33 = vmul.f32 0.2, %v383_v60 }
 0x19d   :  { %v396_v41 = vmax.f32 %v380_v57, %v388_v61  ;;  %v397_v0 = vmax.f32 %v381_v58, %v389_v62  ;;  %v398_v1 = vmax.f32 %v382_v59, %v390_v63 }
 0x19e   :  { %v399_v3 = vmax.f32 %v383_v60, %v391_v33  ;;  %v358_v5 = vpop.permute.xlu2 %357 }
 0x19f   :  { %v404_v7 = vpack.c.bf16 %v397_v0, %v396_v41  ;;  %v364_v8 = vmul.f32 %v358_v5, %v342_v34  ;;  %v365_v9 = vmul.f32 %v358_v5, %v343_v39  ;;  %v366_v10 = vmul.f32 %v358_v5, %v344_v2 }
 0x1a0   :  { %v405_v43 = vpack.c.bf16 %v399_v3, %v398_v1  ;;  %v367_v11 = vmul.f32 %v358_v5, %v345_v4 }
 0x1a1   :  { %408 = vst [vmem:[%s898_s4] sm:$0xff] %v404_v7  ;;  %v384_v44 = vadd.f32 %v378_v6, %v364_v8  ;;  %v385_v12 = vadd.f32 %v378_v6, %v365_v9  ;;  %v386_v13 = vadd.f32 %v378_v6, %v366_v10 }
 0x1a2   :  { %409 = vst [vmem:[%s898_s4 + $0x8] sm:$0xff] %v405_v43  ;;  %v387_v52 = vadd.f32 %v378_v6, %v367_v11 }
 0x1a3   :  { %v392_v56 = vmul.f32 0.2, %v384_v44  ;;  %v393_v14 = vmul.f32 0.2, %v385_v12  ;;  %v394_v15 = vmul.f32 0.2, %v386_v13 }
 0x1a4   :  { %v395_v16 = vmul.f32 0.2, %v387_v52 }
 0x1a5   :  { %v400_v17 = vmax.f32 %v384_v44, %v392_v56  ;;  %v401_v18 = vmax.f32 %v385_v12, %v393_v14  ;;  %v402_v19 = vmax.f32 %v386_v13, %v394_v15 }
 0x1a6   :  { %v403_v20 = vmax.f32 %v387_v52, %v395_v16 }
 0x1a7   :  { %v406_v21 = vpack.c.bf16 %v401_v18, %v400_v17 }
 0x1a8   :  { %v407_v22 = vpack.c.bf16 %v403_v20, %v402_v19 }
 0x1a9   :  { %410 = vst [vmem:[%s898_s4 + $0x10] sm:$0xff] %v406_v21 }
 0x1aa   :  { %411 = vst [vmem:[%s898_s4 + $0x18] sm:$0xff] %v407_v22 }

// kernel: dc_discriminator_forward.6
= control target key start
LH: loop header
LB: loop body
LE: loop exit
PB: predicated region body
PF: predicated region fallthrough
CT: control target
= control target key end

     0   :  { %v520_v44 = vmov 128.0   ;;  %v521_v50 = vmov 0   ;;  %s693_s1 = inlined_call_operand.vmem [shape: bf16[256,128], index: 1, kind: input, shape index: {}]   ;;  %s694_s0 = inlined_call_operand.vmem [shape: bf16[32,256], index: 0, kind: input, shape index: {}]   ;;  %s695_s2 = inlined_call_operand.vmem [shape: f32[32,1], index: 2, kind: input, shape index: {}]   ;;  %s696_s3 = inlined_call_operand.vmem [shape: f32[32,1], index: 3, kind: input, shape index: {}]   ;;  %s697_s4 = inlined_call_operand.vmem [shape: bf16[32,128], index: 4, kind: output, shape index: {}]  }
   0x1   :  { %v469_v0 = vld [vmem:[%s693_s1 + $0x38] sm:$0xff]  ;;  %v468_v2 = vld [vmem:[%s693_s1 + $0x30] sm:$0xff]  ;;  %v467_v4 = vld [vmem:[%s693_s1 + $0x28] sm:$0xff]  ;;  %510 = vrcp.f32 %v520_v44  ;;  %507 = vset.pattern.permute.xlu2 %v521_v50  ;;  %508 = vset.pattern.permute.xlu0 %v521_v50 }
   0x2   :  { %v477_v1 = vld [vmem:[%s693_s1 + $0x78] sm:$0xff]  ;;  %169 = vmatpush.bf16.msra.mxu0 %v469_v0  ;;  %489 = vmatpush.bf16.msra.mxu2 %v469_v0  ;;  %v476_v3 = vld [vmem:[%s693_s1 + $0x70] sm:$0xff]  ;;  %v475_v5 = vld [vmem:[%s693_s1 + $0x68] sm:$0xff] }
   0x3   :  { %188 = vmatpush.bf16.msra.mxu1 %v477_v1  ;;  %497 = vmatpush.bf16.msra.mxu3 %v477_v1  ;;  %v466_v6 = vld [vmem:[%s693_s1 + $0x20] sm:$0xff]  ;;  %v465_v8 = vld [vmem:[%s693_s1 + $0x18] sm:$0xff]  ;;  %v464_v10 = vld [vmem:[%s693_s1 + $0x10] sm:$0xff] }
   0x4   :  { %v474_v7 = vld [vmem:[%s693_s1 + $0x60] sm:$0xff]  ;;  %v473_v9 = vld [vmem:[%s693_s1 + $0x58] sm:$0xff]  ;;  %v472_v11 = vld [vmem:[%s693_s1 + $0x50] sm:$0xff]  ;;  %509 = vset.pattern.permute.xlu1 %v521_v50 }
   0x5   :  { %v463_v12 = vld [vmem:[%s693_s1 + $0x8] sm:$0xff]  ;;  %v462_v14 = vld [vmem:[%s693_s1] sm:$0xff]  ;;  %v388_v18 = vld [vmem:[%s694_s0 + $0x10] sm:$0xf] }
   0x6   :  { %170 = vmatpush.bf16.msra.mxu0 %v468_v2  ;;  %490 = vmatpush.bf16.msra.mxu2 %v468_v2  ;;  %v471_v13 = vld [vmem:[%s693_s1 + $0x48] sm:$0xff]  ;;  %v470_v15 = vld [vmem:[%s693_s1 + $0x40] sm:$0xff]  ;;  %v461_v19 = vld [vmem:[%s694_s0 + $0x14] sm:$0xf0] }
   0x7   :  { %189 = vmatpush.bf16.msra.mxu1 %v476_v3  ;;  %498 = vmatpush.bf16.msra.mxu3 %v476_v3  ;;  %v380_v16 = vld [vmem:[%s694_s0] sm:$0xf]  ;;  %v459_v17 = vld [vmem:[%s694_s0 + $0x4] sm:$0xf0]  ;;  %v458_v20 = vld [vmem:[%s694_s0 + $0x4] sm:$0xf]  ;;  %v389_v25 = vor.u32 %v461_v19, %v388_v18  ;;  %v511_v45 = vpop.eup %510 }
   0x8   :  { %v382_v21 = vld [vmem:[%s694_s0 + $0x8] sm:$0xf0]  ;;  %v460_v22 = vld [vmem:[%s694_s0 + $0x14] sm:$0xf]  ;;  %v390_v23 = vld [vmem:[%s694_s0 + $0x18] sm:$0xf0]  ;;  %v381_v24 = vor.u32 %v459_v17, %v380_v16  ;;  %vm220_vm0 = vweird.f32 %v511_v45 }
   0x9   :  { %v385_v26 = vor.u32 %v458_v20, %v382_v21  ;;  %v393_v27 = vor.u32 %v460_v22, %v390_v23  ;;  %v216_v46 = vmul.f32 128.0, %v511_v45  ;;  %v298_v22 = vld [vmem:[%s695_s2] sm:$0xff] }
   0xa   :  { %171 = vmatpush.bf16.msra.mxu0 %v467_v4  ;;  %491 = vmatpush.bf16.msra.mxu2 %v467_v4 }
   0xb   :  { %190 = vmatpush.bf16.msra.mxu1 %v475_v5  ;;  %499 = vmatpush.bf16.msra.mxu3 %v475_v5  ;;  %v217_v47 = vsub.f32 1.0, %v216_v46 }
   0xd   :  { %v218_v48 = vmul.f32 %v511_v45, %v217_v47 }
   0xe   :  { %172 = vmatpush.bf16.msra.mxu0 %v466_v6  ;;  %492 = vmatpush.bf16.msra.mxu2 %v466_v6 }
   0xf   :  { %191 = vmatpush.bf16.msra.mxu1 %v474_v7  ;;  %500 = vmatpush.bf16.msra.mxu3 %v474_v7  ;;  %v219_v49 = vadd.f32 %v511_v45, %v218_v48  ;;  %v300_v48 = vld [vmem:[%s695_s2 + $0x10] sm:$0xff] }
  0x11   :  { %v221_v51 = vsel %vm220_vm0, %v511_v45, %v219_v49 }
  0x12   :  { %173 = vmatpush.bf16.msra.mxu0 %v465_v8  ;;  %493 = vmatpush.bf16.msra.mxu2 %v465_v8 }
  0x13   :  { %192 = vmatpush.bf16.msra.mxu1 %v473_v9  ;;  %501 = vmatpush.bf16.msra.mxu3 %v473_v9 }
  0x16   :  { %174 = vmatpush.bf16.msra.mxu0 %v464_v10  ;;  %494 = vmatpush.bf16.msra.mxu2 %v464_v10 }
  0x17   :  { %193 = vmatpush.bf16.msra.mxu1 %v472_v11  ;;  %502 = vmatpush.bf16.msra.mxu3 %v472_v11 }
  0x1a   :  { %175 = vmatpush.bf16.msra.mxu0 %v463_v12  ;;  %495 = vmatpush.bf16.msra.mxu2 %v463_v12 }
  0x1b   :  { %194 = vmatpush.bf16.msra.mxu1 %v471_v13  ;;  %503 = vmatpush.bf16.msra.mxu3 %v471_v13 }
  0x1e   :  { %176 = vmatpush.bf16.msra.mxu0 %v462_v14  ;;  %496 = vmatpush.bf16.msra.mxu2 %v462_v14 }
  0x1f   :  { %195 = vmatpush.bf16.msra.mxu1 %v470_v15  ;;  %504 = vmatpush.bf16.msra.mxu3 %v470_v15 }
  0x21   :  { %177 = vmatmul.bf16.vlgmr.msra.gmra.mxu0 %v381_v24  ;;  %182 = vmatmul.bf16.vlgmr.msra.gmra.mxu2 %v389_v25 }
  0x22   :  { %196 = vmatmul.bf16.vlgmr.msra.gmra.mxu1 %v385_v26  ;;  %201 = vmatmul.bf16.vlgmr.msra.gmra.mxu3 %v393_v27 }
  0x9e   :  { %v178_v28 = vpop.f32.mrf.mxu0 }
  0x9f   :  { %v197_v29 = vpop.f32.mrf.mxu1 }
  0xa0   :  { %v619_v30 = vadd.f32 %v197_v29, %v178_v28 }
  0xa2   :  { %207 = vadd.xlane.f32.xlu0 %v619_v30  ;;  %v226_v31 = vmul.f32 %v619_v30, %v619_v30 }
  0xa4   :  { %230 = vadd.xlane.f32.xlu2 %v226_v31  ;;  %v183_v32 = vpop.f32.mrf.mxu2 }
  0xa5   :  { %v202_v33 = vpop.f32.mrf.mxu3 }
  0xa6   :  { %v624_v34 = vadd.f32 %v202_v33, %v183_v32  ;;  %v180_v35 = vpop.f32.mrf.mxu0 }
  0xa7   :  { %v199_v36 = vpop.f32.mrf.mxu1 }
  0xa8   :  { %v626_v37 = vadd.f32 %v199_v36, %v180_v35  ;;  %211 = vadd.xlane.f32.xlu1 %v624_v34  ;;  %v228_v42 = vmul.f32 %v624_v34, %v624_v34  ;;  %v299_v36 = vld [vmem:[%s695_s2 + $0x8] sm:$0xff] }
  0xaa   :  { %209 = vadd.xlane.f32.xlu0 %v626_v37  ;;  %v227_v38 = vmul.f32 %v626_v37, %v626_v37 }
  0xac   :  { %232 = vadd.xlane.f32.xlu2 %v227_v38  ;;  %v185_v39 = vpop.f32.mrf.mxu2 }
  0xad   :  { %v204_v40 = vpop.f32.mrf.mxu3 }
  0xae   :  { %v632_v41 = vadd.f32 %v204_v40, %v185_v39  ;;  %v330_v39 = vld [vmem:[%s696_s3] sm:$0xff] }
  0xb0   :  { %213 = vadd.xlane.f32.xlu1 %v632_v41  ;;  %v229_v43 = vmul.f32 %v632_v41, %v632_v41 }
  0xb2   :  { %234 = vadd.xlane.f32.xlu0 %v228_v42 }
  0xb8   :  { %236 = vadd.xlane.f32.xlu1 %v229_v43 }
 0x115   :  { %v208_v52 = vpop.xlane.xlu0 %207 }
 0x116   :  { %v639_v53 = vmul.f32 %v221_v51, %v208_v52 }
 0x117   :  { %v231_v54 = vpop.xlane.xlu2 %230 }
 0x118   :  { %v242_v55 = vmul.f32 %v639_v53, %v639_v53  ;;  %v238_v56 = vmul.f32 %v231_v54, %v221_v51 }
 0x11a   :  { %v246_v57 = vsub.f32 %v238_v56, %v242_v55  ;;  %v301_v55 = vld [vmem:[%s695_s2 + $0x18] sm:$0xff] }
 0x11b   :  { %v212_v58 = vpop.xlane.xlu1 %211 }
 0x11c   :  { %v250_v59 = vadd.f32 1e-05, %v246_v57  ;;  %v647_v1 = vmul.f32 %v221_v51, %v212_v58  ;;  %v331_v58 = vld [vmem:[%s696_s3 + $0x8] sm:$0xff] }
 0x11d   :  { %v210_v60 = vpop.xlane.xlu0 %209 }
 0x11e   :  { %512 = vrsqrt.f32 %v250_v59  ;;  %v643_v61 = vmul.f32 %v221_v51, %v210_v60  ;;  %v244_v5 = vmul.f32 %v647_v1, %v647_v1  ;;  %vm260_vm2 = vweird.f32 %v250_v59  ;;  %v333_v60 = vld [vmem:[%s696_s3 + $0x18] sm:$0xff] }
 0x11f   :  { %v233_v62 = vpop.xlane.xlu2 %232 }
 0x120   :  { %v243_v63 = vmul.f32 %v643_v61, %v643_v61  ;;  %v239_v0 = vmul.f32 %v233_v62, %v221_v51 }
 0x122   :  { %v247_v2 = vsub.f32 %v239_v0, %v243_v63 }
 0x123   :  { %v214_v3 = vpop.xlane.xlu1 %213 }
 0x124   :  { %v513_v4 = vpop.eup %512  ;;  %v251_v6 = vadd.f32 1e-05, %v247_v2  ;;  %v651_v11 = vmul.f32 %v221_v51, %v214_v3  ;;  %v294_v2 = vsub.f32 %v619_v30, %v639_v53 }
 0x125   :  { %v255_v7 = vmul.f32 %v513_v4, %v250_v59  ;;  %v235_v8 = vpop.xlane.xlu0 %234  ;;  %vm261_vm1 = vweird.f32 %v513_v4  ;;  %v332_v59 = vld [vmem:[%s696_s3 + $0x10] sm:$0xff] }
 0x126   :  { %514 = vrsqrt.f32 %v251_v6  ;;  %v240_v9 = vmul.f32 %v235_v8, %v221_v51  ;;  %v245_v18 = vmul.f32 %v651_v11, %v651_v11  ;;  %vm262_vm3 = vmor %vm260_vm2, %vm261_vm1  ;;  %vm270_vm5 = vweird.f32 %v251_v6 }
 0x127   :  { %v256_v10 = vmul.f32 %v513_v4, %v255_v7  ;;  %v295_v7 = vsub.f32 %v626_v37, %v643_v61  ;;  %v297_v30 = vsub.f32 %v632_v41, %v651_v11 }
 0x128   :  { %v248_v12 = vsub.f32 %v240_v9, %v244_v5  ;;  %v296_v9 = vsub.f32 %v624_v34, %v647_v1 }
 0x129   :  { %v257_v13 = vmul.f32 0.5, %v256_v10 }
 0x12a   :  { %v252_v14 = vadd.f32 1e-05, %v248_v12 }
 0x12b   :  { %v258_v15 = vsub.f32 1.5, %v257_v13  ;;  %v237_v16 = vpop.xlane.xlu1 %236 }
 0x12c   :  { %v515_v17 = vpop.eup %514  ;;  %516 = vrsqrt.f32 %v252_v14  ;;  %v241_v19 = vmul.f32 %v237_v16, %v221_v51  ;;  %vm280_vm8 = vweird.f32 %v252_v14 }
 0x12d   :  { %v265_v20 = vmul.f32 %v515_v17, %v251_v6  ;;  %v259_v21 = vmul.f32 %v513_v4, %v258_v15  ;;  %vm271_vm4 = vweird.f32 %v515_v17 }
 0x12e   :  { %v249_v23 = vsub.f32 %v241_v19, %v245_v18  ;;  %vm272_vm6 = vmor %vm270_vm5, %vm271_vm4 }
 0x12f   :  { %v266_v24 = vmul.f32 %v515_v17, %v265_v20  ;;  %v263_v25 = vsel %vm262_vm3, %v513_v4, %v259_v21 }
 0x130   :  { %v253_v26 = vadd.f32 1e-05, %v249_v23  ;;  %v302_v27 = vmul.f32 %v298_v22, %v263_v25 }
 0x131   :  { %v267_v28 = vmul.f32 0.5, %v266_v24 }
 0x132   :  { %v517_v29 = vpop.eup %516  ;;  %518 = vrsqrt.f32 %v253_v26  ;;  %308 = vperm.xlu2 %507, %v302_v27   ;;  %vm290_vm11 = vweird.f32 %v253_v26 }
 0x133   :  { %v268_v31 = vsub.f32 1.5, %v267_v28  ;;  %v275_v32 = vmul.f32 %v517_v29, %v252_v14  ;;  %vm281_vm7 = vweird.f32 %v517_v29 }
 0x134   :  { %vm282_vm9 = vmor %vm280_vm8, %vm281_vm7 }
 0x135   :  { %v276_v33 = vmul.f32 %v517_v29, %v275_v32  ;;  %v269_v35 = vmul.f32 %v515_v17, %v268_v31 }
 0x137   :  { %v277_v38 = vmul.f32 0.5, %v276_v33  ;;  %v273_v40 = vsel %vm272_vm6, %v515_v17, %v269_v35 }
 0x138   :  { %v519_v42 = vpop.eup %518  ;;  %v303_v43 = vmul.f32 %v299_v36, %v273_v40 }
 0x139   :  { %v278_v44 = vsub.f32 1.5, %v277_v38  ;;  %v285_v45 = vmul.f32 %v519_v42, %v253_v26  ;;  %vm291_vm10 = vweird.f32 %v519_v42 }
 0x13a   :  { %336 = vperm.xlu2 %507, %v330_v39   ;;  %313 = vperm.xlu0 %508, %v303_v43   ;;  %vm292_vm12 = vmor %vm290_vm11, %vm291_vm10 }
 0x13b   :  { %v286_v46 = vmul.f32 %v519_v42, %v285_v45  ;;  %v279_v47 = vmul.f32 %v517_v29, %v278_v44 }
 0x13d   :  { %v287_v49 = vmul.f32 0.5, %v286_v46  ;;  %v283_v50 = vsel %vm282_vm9, %v517_v29, %v279_v47 }
 0x13e   :  { %v304_v51 = vmul.f32 %v300_v48, %v283_v50 }
 0x13f   :  { %v288_v52 = vsub.f32 1.5, %v287_v49 }
 0x140   :  { %318 = vperm.xlu1 %509, %v304_v51  }
 0x141   :  { %v289_v54 = vmul.f32 %v519_v42, %v288_v52 }
 0x143   :  { %v293_v56 = vsel %vm292_vm12, %v519_v42, %v289_v54 }
 0x144   :  { %v305_v57 = vmul.f32 %v301_v55, %v293_v56 }
 0x146   :  { %323 = vperm.xlu2 %507, %v305_v57  }
 0x148   :  { %341 = vperm.xlu1 %509, %v331_v58  }
 0x14e   :  { %346 = vperm.xlu2 %507, %v332_v59  }
 0x150   :  { %351 = vperm.xlu1 %509, %v333_v60  }
 0x18c   :  { %v309_v62 = vpop.permute.xlu2 %308 }
 0x18d   :  { %v326_v3 = vmul.f32 %v309_v62, %v294_v2 }
 0x194   :  { %v337_v63 = vpop.permute.xlu2 %336 }
 0x195   :  { %v354_v6 = vadd.f32 %v337_v63, %v326_v3 }
 0x197   :  { %v358_v12 = vmul.f32 0.2, %v354_v6 }
 0x199   :  { %v362_v17 = vmax.f32 %v354_v6, %v358_v12 }
 0x1a0   :  { %v324_v4 = vpop.permute.xlu2 %323 }
 0x1a1   :  { %v329_v19 = vmul.f32 %v324_v4, %v297_v30 }
 0x1a8   :  { %v347_v16 = vpop.permute.xlu2 %346 }
 0x1ac   :  { %v314_v5 = vpop.permute.xlu0 %313 }
 0x1ad   :  { %v327_v8 = vmul.f32 %v314_v5, %v295_v7 }
 0x1b2   :  { %v319_v0 = vpop.permute.xlu1 %318 }
 0x1b3   :  { %v328_v13 = vmul.f32 %v319_v0, %v296_v9 }
 0x1b5   :  { %v356_v53 = vadd.f32 %v347_v16, %v328_v13 }
 0x1b7   :  { %v360_v37 = vmul.f32 0.2, %v356_v53 }
 0x1b9   :  { %v364_v1 = vmax.f32 %v356_v53, %v360_v37 }
 0x1ba   :  { %v342_v10 = vpop.permute.xlu1 %341 }
 0x1bb   :  { %v355_v14 = vadd.f32 %v342_v10, %v327_v8 }
 0x1bd   :  { %v359_v15 = vmul.f32 0.2, %v355_v14 }
 0x1bf   :  { %v363_v18 = vmax.f32 %v355_v14, %v359_v15 }
 0x1c1   :  { %v481_v20 = vpack.c.bf16 %v363_v18, %v362_v17 }
 0x1c2   :  { %v352_v21 = vpop.permute.xlu1 %351 }
 0x1c3   :  { %482 = vst [vmem:[%s697_s4] sm:$0xff] %v481_v20   ;;  %v357_v34 = vadd.f32 %v352_v21, %v329_v19 }
 0x1c5   :  { %v361_v61 = vmul.f32 0.2, %v357_v34 }
 0x1c7   :  { %v365_v22 = vmax.f32 %v357_v34, %v361_v61 }
 0x1c9   :  { %v486_v23 = vpack.c.bf16 %v365_v22, %v364_v1 }
 0x1cb   :  { %488 = vst [vmem:[%s697_s4 + $0x8] sm:$0xff] %v486_v23  }

// kernel: dc_discriminator_forward.7
= control target key start
LH: loop header
LB: loop body
LE: loop exit
PB: predicated region body
PF: predicated region fallthrough
CT: control target
= control target key end

     0   :  { %vm488_vm0 = vcmask 261120   ;;  %s1569_s1 = inlined_call_operand.vmem [shape: bf16[512,32], index: 1, kind: input, shape index: {}]   ;;  %s1570_s0 = inlined_call_operand.vmem [shape: bf16[64,512], index: 0, kind: input, shape index: {}]   ;;  %s1571_s3 = inlined_call_operand.vmem [shape: f32[64,1], index: 3, kind: input, shape index: {}]   ;;  %s1572_s2 = inlined_call_operand.vmem [shape: f32[64,1], index: 2, kind: input, shape index: {}]   ;;  %s1573_s4 = inlined_call_operand.vmem [shape: f32[64,32], index: 4, kind: input, shape index: {}]   ;;  %s1574_s5 = inlined_call_operand.vmem [shape: f32[1,32], index: 5, kind: output, shape index: {}]  }
   0x1   :  { %v1082_v0 = vld [vmem:[%s1569_s1 + $0x38] sm:$0xff]  ;;  %v1081_v4 = vld [vmem:[%s1569_s1 + $0x30] sm:$0xff]  ;;  %v1080_v8 = vld [vmem:[%s1569_s1 + $0x28] sm:$0xff] }
   0x2   :  { %v1090_v1 = vld [vmem:[%s1569_s1 + $0x78] sm:$0xff]  ;;  %372 = vmatpush.bf16.msra.mxu0 %v1082_v0  ;;  %v1089_v5 = vld [vmem:[%s1569_s1 + $0x70] sm:$0xff]  ;;  %v1088_v9 = vld [vmem:[%s1569_s1 + $0x68] sm:$0xff] }
   0x3   :  { %v1098_v2 = vld [vmem:[%s1569_s1 + $0xb8] sm:$0xff]  ;;  %401 = vmatpush.bf16.msra.mxu1 %v1090_v1  ;;  %v1097_v6 = vld [vmem:[%s1569_s1 + $0xb0] sm:$0xff]  ;;  %v1096_v10 = vld [vmem:[%s1569_s1 + $0xa8] sm:$0xff] }
   0x4   :  { %v1106_v3 = vld [vmem:[%s1569_s1 + $0xf8] sm:$0xff]  ;;  %430 = vmatpush.bf16.msra.mxu2 %v1098_v2  ;;  %v1105_v7 = vld [vmem:[%s1569_s1 + $0xf0] sm:$0xff]  ;;  %v1104_v11 = vld [vmem:[%s1569_s1 + $0xe8] sm:$0xff] }
   0x5   :  { %459 = vmatpush.bf16.msra.mxu3 %v1106_v3  ;;  %v1079_v12 = vld [vmem:[%s1569_s1 + $0x20] sm:$0xff]  ;;  %v1078_v16 = vld [vmem:[%s1569_s1 + $0x18] sm:$0xff]  ;;  %v1077_v20 = vld [vmem:[%s1569_s1 + $0x10] sm:$0xff] }
   0x6   :  { %373 = vmatpush.bf16.msra.mxu0 %v1081_v4  ;;  %v1087_v13 = vld [vmem:[%s1569_s1 + $0x60] sm:$0xff]  ;;  %v1086_v17 = vld [vmem:[%s1569_s1 + $0x58] sm:$0xff]  ;;  %v1085_v21 = vld [vmem:[%s1569_s1 + $0x50] sm:$0xff] }
   0x7   :  { %402 = vmatpush.bf16.msra.mxu1 %v1089_v5  ;;  %v1095_v14 = vld [vmem:[%s1569_s1 + $0xa0] sm:$0xff]  ;;  %v1094_v18 = vld [vmem:[%s1569_s1 + $0x98] sm:$0xff]  ;;  %v1093_v22 = vld [vmem:[%s1569_s1 + $0x90] sm:$0xff] }
   0x8   :  { %431 = vmatpush.bf16.msra.mxu2 %v1097_v6  ;;  %v1103_v15 = vld [vmem:[%s1569_s1 + $0xe0] sm:$0xff]  ;;  %v1102_v19 = vld [vmem:[%s1569_s1 + $0xd8] sm:$0xff]  ;;  %v1101_v23 = vld [vmem:[%s1569_s1 + $0xd0] sm:$0xff] }
   0x9   :  { %460 = vmatpush.bf16.msra.mxu3 %v1105_v7  ;;  %v1076_v24 = vld [vmem:[%s1569_s1 + $0x8] sm:$0xff]  ;;  %v1075_v28 = vld [vmem:[%s1569_s1] sm:$0xff]  ;;  %v1061_v33 = vld [vmem:[%s1570_s0 + $0xc] sm:$0xf0] }
   0xa   :  { %374 = vmatpush.bf16.msra.mxu0 %v1080_v8  ;;  %v1084_v25 = vld [vmem:[%s1569_s1 + $0x48] sm:$0xff]  ;;  %v1083_v29 = vld [vmem:[%s1569_s1 + $0x40] sm:$0xff]  ;;  %v871_v35 = vld [vmem:[%s1570_s0 + $0x10] sm:$0xf0] }
   0xb   :  { %403 = vmatpush.bf16.msra.mxu1 %v1088_v9  ;;  %v1092_v26 = vld [vmem:[%s1569_s1 + $0x88] sm:$0xff]  ;;  %v1091_v30 = vld [vmem:[%s1569_s1 + $0x80] sm:$0xff]  ;;  %v1062_v37 = vld [vmem:[%s1570_s0 + $0x14] sm:$0xf0] }
   0xc   :  { %432 = vmatpush.bf16.msra.mxu2 %v1096_v10  ;;  %v1100_v27 = vld [vmem:[%s1569_s1 + $0xc8] sm:$0xff]  ;;  %v1099_v31 = vld [vmem:[%s1569_s1 + $0xc0] sm:$0xff]  ;;  %v879_v39 = vld [vmem:[%s1570_s0 + $0x18] sm:$0xf0] }
   0xd   :  { %461 = vmatpush.bf16.msra.mxu3 %v1104_v11  ;;  %v869_v32 = vld [vmem:[%s1570_s0] sm:$0xf]  ;;  %v1059_v34 = vld [vmem:[%s1570_s0 + $0x4] sm:$0xf]  ;;  %v877_v36 = vld [vmem:[%s1570_s0 + $0x8] sm:$0xf] }
   0xe   :  { %375 = vmatpush.bf16.msra.mxu0 %v1079_v12  ;;  %v1060_v38 = vld [vmem:[%s1570_s0 + $0xc] sm:$0xf]  ;;  %v870_v40 = vor.u32 %v1061_v33, %v869_v32  ;;  %v874_v41 = vor.u32 %v1059_v34, %v871_v35  ;;  %v878_v42 = vor.u32 %v1062_v37, %v877_v36  ;;  %v885_v44 = vld [vmem:[%s1570_s0 + $0x20] sm:$0xf]  ;;  %v1065_v45 = vld [vmem:[%s1570_s0 + $0x2c] sm:$0xf0] }
   0xf   :  { %404 = vmatpush.bf16.msra.mxu1 %v1087_v13  ;;  %v882_v43 = vor.u32 %v1060_v38, %v879_v39  ;;  %v1063_v46 = vld [vmem:[%s1570_s0 + $0x24] sm:$0xf]  ;;  %v887_v47 = vld [vmem:[%s1570_s0 + $0x30] sm:$0xf0]  ;;  %v893_v48 = vld [vmem:[%s1570_s0 + $0x28] sm:$0xf]  ;;  %v886_v52 = vor.u32 %v1065_v45, %v885_v44 }
  0x10   :  { %433 = vmatpush.bf16.msra.mxu2 %v1095_v14  ;;  %v1066_v49 = vld [vmem:[%s1570_s0 + $0x34] sm:$0xf0]  ;;  %v1064_v50 = vld [vmem:[%s1570_s0 + $0x2c] sm:$0xf]  ;;  %v895_v51 = vld [vmem:[%s1570_s0 + $0x38] sm:$0xf0]  ;;  %v890_v53 = vor.u32 %v1063_v46, %v887_v47 }
  0x11   :  { %462 = vmatpush.bf16.msra.mxu3 %v1103_v15  ;;  %v894_v54 = vor.u32 %v1066_v49, %v893_v48  ;;  %v898_v55 = vor.u32 %v1064_v50, %v895_v51  ;;  %v901_v56 = vld [vmem:[%s1570_s0 + $0x40] sm:$0xf]  ;;  %v1069_v57 = vld [vmem:[%s1570_s0 + $0x4c] sm:$0xf0]  ;;  %v1067_v58 = vld [vmem:[%s1570_s0 + $0x44] sm:$0xf] }
  0x12   :  { %376 = vmatpush.bf16.msra.mxu0 %v1078_v16  ;;  %v903_v59 = vld [vmem:[%s1570_s0 + $0x50] sm:$0xf0]  ;;  %v909_v60 = vld [vmem:[%s1570_s0 + $0x48] sm:$0xf]  ;;  %v1070_v61 = vld [vmem:[%s1570_s0 + $0x54] sm:$0xf0]  ;;  %v902_v0 = vor.u32 %v1069_v57, %v901_v56 }
  0x13   :  { %405 = vmatpush.bf16.msra.mxu1 %v1086_v17  ;;  %v1068_v62 = vld [vmem:[%s1570_s0 + $0x4c] sm:$0xf]  ;;  %v911_v63 = vld [vmem:[%s1570_s0 + $0x58] sm:$0xf0]  ;;  %v906_v1 = vor.u32 %v1067_v58, %v903_v59  ;;  %v910_v2 = vor.u32 %v1070_v61, %v909_v60  ;;  %v917_v4 = vld [vmem:[%s1570_s0 + $0x60] sm:$0xf] }
  0x14   :  { %434 = vmatpush.bf16.msra.mxu2 %v1094_v18  ;;  %v914_v3 = vor.u32 %v1068_v62, %v911_v63  ;;  %v1073_v5 = vld [vmem:[%s1570_s0 + $0x6c] sm:$0xf0]  ;;  %v1071_v6 = vld [vmem:[%s1570_s0 + $0x64] sm:$0xf]  ;;  %v919_v7 = vld [vmem:[%s1570_s0 + $0x70] sm:$0xf0] }
  0x15   :  { %463 = vmatpush.bf16.msra.mxu3 %v1102_v19  ;;  %v925_v8 = vld [vmem:[%s1570_s0 + $0x68] sm:$0xf]  ;;  %v1074_v9 = vld [vmem:[%s1570_s0 + $0x74] sm:$0xf0]  ;;  %v1072_v10 = vld [vmem:[%s1570_s0 + $0x6c] sm:$0xf]  ;;  %v918_v12 = vor.u32 %v1073_v5, %v917_v4  ;;  %v922_v13 = vor.u32 %v1071_v6, %v919_v7 }
  0x16   :  { %377 = vmatpush.bf16.msra.mxu0 %v1077_v20  ;;  %v927_v11 = vld [vmem:[%s1570_s0 + $0x78] sm:$0xf0]  ;;  %v926_v14 = vor.u32 %v1074_v9, %v925_v8 }
  0x17   :  { %406 = vmatpush.bf16.msra.mxu1 %v1085_v21  ;;  %v930_v15 = vor.u32 %v1072_v10, %v927_v11 }
  0x18   :  { %435 = vmatpush.bf16.msra.mxu2 %v1093_v22 }
  0x19   :  { %464 = vmatpush.bf16.msra.mxu3 %v1101_v23 }
  0x1a   :  { %378 = vmatpush.bf16.msra.mxu0 %v1076_v24 }
  0x1b   :  { %407 = vmatpush.bf16.msra.mxu1 %v1084_v25 }
  0x1c   :  { %436 = vmatpush.bf16.msra.mxu2 %v1092_v26 }
  0x1d   :  { %465 = vmatpush.bf16.msra.mxu3 %v1100_v27 }
  0x1e   :  { %379 = vmatpush.bf16.msra.mxu0 %v1075_v28 }
  0x1f   :  { %408 = vmatpush.bf16.msra.mxu1 %v1083_v29 }
  0x20   :  { %437 = vmatpush.bf16.msra.mxu2 %v1091_v30 }
  0x21   :  { %466 = vmatpush.bf16.msra.mxu3 %v1099_v31  ;;  %380 = vmatmul.bf16.vlgmr.msra.gmra.mxu0 %v870_v40 }
  0x22   :  { %409 = vmatmul.bf16.vlgmr.msra.gmra.mxu1 %v874_v41 }
  0x23   :  { %438 = vmatmul.bf16.vlgmr.msra.gmra.mxu2 %v878_v42 }
  0x24   :  { %467 = vmatmul.bf16.vlgmr.msra.gmra.mxu3 %v882_v43 }
  0x31   :  { %385 = vmatmul.bf16.gmra.mxu0 %v886_v52 }
  0x32   :  { %414 = vmatmul.bf16.gmra.mxu1 %v890_v53 }
  0x33   :  { %443 = vmatmul.bf16.gmra.mxu2 %v894_v54 }
  0x34   :  { %472 = vmatmul.bf16.gmra.mxu3 %v898_v55 }
  0x41   :  { %390 = vmatmul.bf16.gmra.mxu0 %v902_v0 }
  0x42   :  { %419 = vmatmul.bf16.gmra.mxu1 %v906_v1 }
  0x43   :  { %448 = vmatmul.bf16.gmra.mxu2 %v910_v2 }
  0x44   :  { %477 = vmatmul.bf16.gmra.mxu3 %v914_v3 }
  0x51   :  { %395 = vmatmul.bf16.gmra.mxu0 %v918_v12 }
  0x52   :  { %424 = vmatmul.bf16.gmra.mxu1 %v922_v13 }
  0x53   :  { %453 = vmatmul.bf16.gmra.mxu2 %v926_v14 }
  0x54   :  { %482 = vmatmul.bf16.gmra.mxu3 %v930_v15 }
  0x9e   :  { %v381_v16 = vpop.f32.mrf.mxu0 }
  0x9f   :  { %v410_v17 = vpop.f32.mrf.mxu1 }
  0xa0   :  { %v411_v18 = vadd.f32 %v410_v17, %v381_v16 }
  0xa6   :  { %v439_v19 = vpop.f32.mrf.mxu2  ;;  %v383_v22 = vpop.f32.mrf.mxu0 }
  0xa7   :  { %v468_v20 = vpop.f32.mrf.mxu3  ;;  %v440_v21 = vadd.f32 %v439_v19, %v411_v18  ;;  %v412_v23 = vpop.f32.mrf.mxu1 }
  0xa8   :  { %v413_v27 = vadd.f32 %v412_v23, %v383_v22 }
  0xa9   :  { %v1356_v24 = vadd.f32 %v468_v20, %v440_v21 }
  0xab   :  { %v489_v25 = vsel %vm488_vm0, %v1356_v24, 0.0  ;;  %v528_v26 = vmul.f32 %v1356_v24, %v1356_v24 }
  0xac   :  { %490 = vadd.xlane.f32.xlu0 %v489_v25 }
  0xad   :  { %v536_v28 = vsel %vm488_vm0, %v528_v26, 0.0 }
  0xae   :  { %v441_v29 = vpop.f32.mrf.mxu2  ;;  %537 = vadd.xlane.f32.xlu1 %v536_v28  ;;  %v386_v32 = vpop.f32.mrf.mxu0 }
  0xaf   :  { %v470_v30 = vpop.f32.mrf.mxu3  ;;  %v442_v31 = vadd.f32 %v441_v29, %v413_v27  ;;  %v415_v33 = vpop.f32.mrf.mxu1 }
  0xb0   :  { %v416_v35 = vadd.f32 %v415_v33, %v386_v32  ;;  %v1131_v33 = vmov 0  }
  0xb1   :  { %v1363_v34 = vadd.f32 %v470_v30, %v442_v31  ;;  %1110 = vset.pattern.permute.xlu1 %v1131_v33  ;;  %1111 = vset.pattern.permute.xlu2 %v1131_v33 }
  0xb2   :  { %1112 = vset.pattern.permute.xlu0 %v1131_v33  ;;  %v681_v33 = vld [vmem:[%s1572_s2 + $0x8] sm:$0xff] }
  0xb3   :  { %v492_v36 = vsel %vm488_vm0, %v1363_v34, 0.0  ;;  %v529_v37 = vmul.f32 %v1363_v34, %v1363_v34 }
  0xb4   :  { %493 = vadd.xlane.f32.xlu0 %v492_v36  ;;  %v1132_v36 = vmov 32.0  }
  0xb5   :  { %v539_v38 = vsel %vm488_vm0, %v529_v37, 0.0  ;;  %1113 = vrcp.f32 %v1132_v36 }
  0xb6   :  { %v444_v39 = vpop.f32.mrf.mxu2  ;;  %540 = vadd.xlane.f32.xlu2 %v539_v38  ;;  %v388_v42 = vpop.f32.mrf.mxu0  ;;  %v746_v38 = vld [vmem:[%s1571_s3 + $0x10] sm:$0xff] }
  0xb7   :  { %v473_v40 = vpop.f32.mrf.mxu3  ;;  %v445_v41 = vadd.f32 %v444_v39, %v416_v35  ;;  %v417_v43 = vpop.f32.mrf.mxu1  ;;  %v744_v35 = vld [vmem:[%s1571_s3] sm:$0xff] }
  0xb8   :  { %v418_v47 = vadd.f32 %v417_v43, %v388_v42  ;;  %v747_v42 = vld [vmem:[%s1571_s3 + $0x18] sm:$0xff] }
  0xb9   :  { %v1370_v44 = vadd.f32 %v473_v40, %v445_v41  ;;  %v745_v41 = vld [vmem:[%s1571_s3 + $0x8] sm:$0xff] }
  0xbb   :  { %v495_v45 = vsel %vm488_vm0, %v1370_v44, 0.0  ;;  %v530_v46 = vmul.f32 %v1370_v44, %v1370_v44  ;;  %v1114_v37 = vpop.eup %1113 }
  0xbc   :  { %496 = vadd.xlane.f32.xlu1 %v495_v45  ;;  %v514_v39 = vmul.f32 32.0, %v1114_v37  ;;  %vm518_vm1 = vweird.f32 %v1114_v37 }
  0xbd   :  { %v542_v48 = vsel %vm488_vm0, %v530_v46, 0.0  ;;  %v748_v46 = vld [vmem:[%s1571_s3 + $0x20] sm:$0xff] }
  0xbe   :  { %v446_v49 = vpop.f32.mrf.mxu2  ;;  %543 = vadd.xlane.f32.xlu0 %v542_v48  ;;  %v391_v52 = vpop.f32.mrf.mxu0  ;;  %v515_v40 = vsub.f32 1.0, %v514_v39 }
  0xbf   :  { %v475_v50 = vpop.f32.mrf.mxu3  ;;  %v447_v51 = vadd.f32 %v446_v49, %v418_v47  ;;  %v420_v53 = vpop.f32.mrf.mxu1 }
  0xc0   :  { %v421_v55 = vadd.f32 %v420_v53, %v391_v52  ;;  %v516_v43 = vmul.f32 %v1114_v37, %v515_v40  ;;  %v749_v53 = vld [vmem:[%s1571_s3 + $0x28] sm:$0xff] }
  0xc1   :  { %v1377_v54 = vadd.f32 %v475_v50, %v447_v51 }
  0xc2   :  { %v517_v45 = vadd.f32 %v1114_v37, %v516_v43 }
  0xc3   :  { %v498_v56 = vsel %vm488_vm0, %v1377_v54, 0.0  ;;  %v531_v62 = vmul.f32 %v1377_v54, %v1377_v54 }
  0xc4   :  { %499 = vadd.xlane.f32.xlu2 %v498_v56  ;;  %v1427_v47 = vsel %vm518_vm1, %v1114_v37, %v517_v45 }
  0xc5   :  { %v545_v0 = vsel %vm488_vm0, %v531_v62, 0.0 }
  0xc6   :  { %v449_v57 = vpop.f32.mrf.mxu2  ;;  %v393_v60 = vpop.f32.mrf.mxu0 }
  0xc7   :  { %v478_v58 = vpop.f32.mrf.mxu3  ;;  %v450_v59 = vadd.f32 %v449_v57, %v421_v55  ;;  %v422_v61 = vpop.f32.mrf.mxu1 }
  0xc8   :  { %v423_v2 = vadd.f32 %v422_v61, %v393_v60 }
  0xc9   :  { %v1383_v63 = vadd.f32 %v478_v58, %v450_v59 }
  0xcb   :  { %v501_v1 = vsel %vm488_vm0, %v1383_v63, 0.0  ;;  %v532_v6 = vmul.f32 %v1383_v63, %v1383_v63 }
  0xcc   :  { %546 = vadd.xlane.f32.xlu2 %v545_v0  ;;  %502 = vadd.xlane.f32.xlu1 %v501_v1 }
  0xcd   :  { %v548_v11 = vsel %vm488_vm0, %v532_v6, 0.0 }
  0xce   :  { %v451_v3 = vpop.f32.mrf.mxu2  ;;  %v396_v7 = vpop.f32.mrf.mxu0 }
  0xcf   :  { %v480_v4 = vpop.f32.mrf.mxu3  ;;  %v452_v5 = vadd.f32 %v451_v3, %v423_v2  ;;  %v425_v8 = vpop.f32.mrf.mxu1 }
  0xd0   :  { %v426_v10 = vadd.f32 %v425_v8, %v396_v7 }
  0xd1   :  { %v1390_v9 = vadd.f32 %v480_v4, %v452_v5 }
  0xd3   :  { %v504_v12 = vsel %vm488_vm0, %v1390_v9, 0.0  ;;  %v533_v16 = vmul.f32 %v1390_v9, %v1390_v9 }
  0xd4   :  { %549 = vadd.xlane.f32.xlu1 %v548_v11  ;;  %505 = vadd.xlane.f32.xlu0 %v504_v12 }
  0xd5   :  { %v551_v21 = vsel %vm488_vm0, %v533_v16, 0.0 }
  0xd6   :  { %v454_v13 = vpop.f32.mrf.mxu2  ;;  %v398_v18 = vpop.f32.mrf.mxu0 }
  0xd7   :  { %v483_v14 = vpop.f32.mrf.mxu3  ;;  %v455_v15 = vadd.f32 %v454_v13, %v426_v10  ;;  %v427_v19 = vpop.f32.mrf.mxu1 }
  0xd8   :  { %v428_v22 = vadd.f32 %v427_v19, %v398_v18  ;;  %v680_v19 = vld [vmem:[%s1572_s2] sm:$0xff] }
  0xd9   :  { %v1397_v17 = vadd.f32 %v483_v14, %v455_v15 }
  0xdb   :  { %v507_v20 = vsel %vm488_vm0, %v1397_v17, 0.0  ;;  %v534_v26 = vmul.f32 %v1397_v17, %v1397_v17 }
  0xdc   :  { %508 = vadd.xlane.f32.xlu2 %v507_v20  ;;  %552 = vadd.xlane.f32.xlu0 %v551_v21 }
  0xdd   :  { %v554_v29 = vsel %vm488_vm0, %v534_v26, 0.0 }
  0xde   :  { %v456_v23 = vpop.f32.mrf.mxu2 }
  0xdf   :  { %v457_v25 = vadd.f32 %v456_v23, %v428_v22  ;;  %v485_v27 = vpop.f32.mrf.mxu3 }
  0xe1   :  { %v1404_v28 = vadd.f32 %v485_v27, %v457_v25 }
  0xe3   :  { %v510_v30 = vsel %vm488_vm0, %v1404_v28, 0.0  ;;  %v535_v31 = vmul.f32 %v1404_v28, %v1404_v28 }
  0xe4   :  { %555 = vadd.xlane.f32.xlu2 %v554_v29  ;;  %511 = vadd.xlane.f32.xlu1 %v510_v30 }
  0xe5   :  { %v557_v32 = vsel %vm488_vm0, %v535_v31, 0.0 }
  0xe6   :  { %558 = vadd.xlane.f32.xlu0 %v557_v32 }
  0xfa   :  { %779 = vperm.xlu0 %1112, %v749_v53  }
  0xfc   :  { %759 = vperm.xlu2 %1111, %v745_v41  }
  0xfd   :  { %754 = vperm.xlu1 %1110, %v744_v35  }
 0x104   :  { %774 = vperm.xlu2 %1111, %v748_v46  }
 0x105   :  { %764 = vperm.xlu1 %1110, %v746_v38  }
 0x10d   :  { %769 = vperm.xlu1 %1110, %v747_v42  }
 0x11f   :  { %v491_v48 = vpop.xlane.xlu0 %490 }
 0x120   :  { %v1430_v49 = vmul.f32 %v1427_v47, %v491_v48 }
 0x121   :  { %v538_v50 = vpop.xlane.xlu1 %537 }
 0x122   :  { %v568_v51 = vmul.f32 %v1430_v49, %v1430_v49  ;;  %v560_v52 = vmul.f32 %v538_v50, %v1427_v47 }
 0x124   :  { %v576_v55 = vsub.f32 %v560_v52, %v568_v51  ;;  %v682_v51 = vld [vmem:[%s1572_s2 + $0x10] sm:$0xff] }
 0x126   :  { %v584_v56 = vadd.f32 1e-05, %v576_v55 }
 0x127   :  { %v494_v57 = vpop.xlane.xlu0 %493 }
 0x128   :  { %1115 = vrsqrt.f32 %v584_v56  ;;  %v1439_v58 = vmul.f32 %v1427_v47, %v494_v57  ;;  %vm598_vm3 = vweird.f32 %v584_v56 }
 0x129   :  { %v541_v59 = vpop.xlane.xlu2 %540 }
 0x12a   :  { %v569_v60 = vmul.f32 %v1439_v58, %v1439_v58  ;;  %v561_v61 = vmul.f32 %v541_v59, %v1427_v47 }
 0x12c   :  { %v577_v62 = vsub.f32 %v561_v61, %v569_v60 }
 0x12e   :  { %v1116_v0 = vpop.eup %1115  ;;  %v585_v1 = vadd.f32 1e-05, %v577_v62 }
 0x12f   :  { %v593_v2 = vmul.f32 %v1116_v0, %v584_v56  ;;  %v497_v3 = vpop.xlane.xlu1 %496  ;;  %vm599_vm2 = vweird.f32 %v1116_v0 }
 0x130   :  { %1117 = vrsqrt.f32 %v585_v1  ;;  %v1445_v4 = vmul.f32 %v1427_v47, %v497_v3  ;;  %vm600_vm4 = vmor %vm598_vm3, %vm599_vm2  ;;  %vm608_vm6 = vweird.f32 %v585_v1 }
 0x131   :  { %v594_v5 = vmul.f32 %v1116_v0, %v593_v2  ;;  %v544_v6 = vpop.xlane.xlu0 %543 }
 0x132   :  { %v570_v7 = vmul.f32 %v1445_v4, %v1445_v4  ;;  %v562_v8 = vmul.f32 %v544_v6, %v1427_v47 }
 0x133   :  { %v595_v10 = vmul.f32 0.5, %v594_v5 }
 0x134   :  { %v578_v11 = vsub.f32 %v562_v8, %v570_v7 }
 0x135   :  { %v596_v12 = vsub.f32 1.5, %v595_v10 }
 0x136   :  { %v1118_v13 = vpop.eup %1117  ;;  %v586_v14 = vadd.f32 1e-05, %v578_v11 }
 0x137   :  { %v603_v15 = vmul.f32 %v1118_v13, %v585_v1  ;;  %v500_v16 = vpop.xlane.xlu2 %499  ;;  %v597_v18 = vmul.f32 %v1116_v0, %v596_v12  ;;  %vm609_vm5 = vweird.f32 %v1118_v13 }
 0x138   :  { %1119 = vrsqrt.f32 %v586_v14  ;;  %v1454_v25 = vmul.f32 %v1427_v47, %v500_v16  ;;  %vm610_vm7 = vmor %vm608_vm6, %vm609_vm5  ;;  %vm618_vm9 = vweird.f32 %v586_v14 }
 0x139   :  { %v604_v20 = vmul.f32 %v1118_v13, %v603_v15  ;;  %v601_v21 = vsel %vm600_vm4, %v1116_v0, %v597_v18  ;;  %v683_v15 = vld [vmem:[%s1572_s2 + $0x18] sm:$0xff] }
 0x13a   :  { %v688_v22 = vmul.f32 %v680_v19, %v601_v21  ;;  %v571_v35 = vmul.f32 %v1454_v25, %v1454_v25 }
 0x13b   :  { %v605_v23 = vmul.f32 0.5, %v604_v20 }
 0x13c   :  { %698 = vperm.xlu1 %1110, %v688_v22  }
 0x13d   :  { %v606_v26 = vsub.f32 1.5, %v605_v23 }
 0x13e   :  { %v1120_v27 = vpop.eup %1119 }
 0x13f   :  { %v613_v29 = vmul.f32 %v1120_v27, %v586_v14  ;;  %v547_v30 = vpop.xlane.xlu2 %546  ;;  %v503_v31 = vpop.xlane.xlu1 %502  ;;  %v607_v32 = vmul.f32 %v1118_v13, %v606_v26  ;;  %vm619_vm8 = vweird.f32 %v1120_v27 }
 0x140   :  { %v563_v36 = vmul.f32 %v547_v30, %v1427_v47  ;;  %v1463_v43 = vmul.f32 %v1427_v47, %v503_v31  ;;  %vm620_vm10 = vmor %vm618_vm9, %vm619_vm8 }
 0x141   :  { %v614_v37 = vmul.f32 %v1120_v27, %v613_v29  ;;  %v611_v38 = vsel %vm610_vm7, %v1118_v13, %v607_v32 }
 0x142   :  { %v579_v39 = vsub.f32 %v563_v36, %v571_v35  ;;  %v689_v40 = vmul.f32 %v681_v33, %v611_v38  ;;  %v572_v52 = vmul.f32 %v1463_v43, %v1463_v43 }
 0x143   :  { %v615_v41 = vmul.f32 0.5, %v614_v37 }
 0x144   :  { %v587_v42 = vadd.f32 1e-05, %v579_v39  ;;  %703 = vperm.xlu2 %1111, %v689_v40   ;;  %v684_v40 = vld [vmem:[%s1572_s2 + $0x20] sm:$0xff] }
 0x145   :  { %v616_v45 = vsub.f32 1.5, %v615_v41 }
 0x146   :  { %1121 = vrsqrt.f32 %v587_v42  ;;  %vm628_vm12 = vweird.f32 %v587_v42 }
 0x147   :  { %v550_v46 = vpop.xlane.xlu1 %549  ;;  %v506_v48 = vpop.xlane.xlu0 %505  ;;  %v617_v50 = vmul.f32 %v1120_v27, %v616_v45 }
 0x148   :  { %v564_v53 = vmul.f32 %v550_v46, %v1427_v47  ;;  %v1472_v61 = vmul.f32 %v1427_v47, %v506_v48 }
 0x149   :  { %v621_v55 = vsel %vm620_vm10, %v1120_v27, %v617_v50 }
 0x14a   :  { %v580_v56 = vsub.f32 %v564_v53, %v572_v52  ;;  %v690_v57 = vmul.f32 %v682_v51, %v621_v55  ;;  %v573_v3 = vmul.f32 %v1472_v61, %v1472_v61  ;;  %v685_v53 = vld [vmem:[%s1572_s2 + $0x28] sm:$0xff] }
 0x14c   :  { %v1122_v59 = vpop.eup %1121  ;;  %v588_v60 = vadd.f32 1e-05, %v580_v56  ;;  %708 = vperm.xlu0 %1112, %v690_v57  }
 0x14d   :  { %v623_v62 = vmul.f32 %v1122_v59, %v587_v42  ;;  %vm629_vm11 = vweird.f32 %v1122_v59 }
 0x14e   :  { %1123 = vrsqrt.f32 %v588_v60  ;;  %vm630_vm13 = vmor %vm628_vm12, %vm629_vm11  ;;  %vm638_vm15 = vweird.f32 %v588_v60  ;;  %vm857_vm11 = vcmask 253952  }
 0x14f   :  { %v624_v0 = vmul.f32 %v1122_v59, %v623_v62  ;;  %v509_v1 = vpop.xlane.xlu2 %508  ;;  %v553_v2 = vpop.xlane.xlu0 %552 }
 0x150   :  { %v565_v5 = vmul.f32 %v553_v2, %v1427_v47  ;;  %v1478_v11 = vmul.f32 %v1427_v47, %v509_v1 }
 0x151   :  { %v625_v6 = vmul.f32 0.5, %v624_v0 }
 0x152   :  { %v581_v7 = vsub.f32 %v565_v5, %v573_v3  ;;  %v574_v21 = vmul.f32 %v1478_v11, %v1478_v11 }
 0x153   :  { %v626_v8 = vsub.f32 1.5, %v625_v6  ;;  %v686_v6 = vld [vmem:[%s1572_s2 + $0x30] sm:$0xff] }
 0x154   :  { %v1124_v10 = vpop.eup %1123  ;;  %v589_v12 = vadd.f32 1e-05, %v581_v7 }
 0x155   :  { %v633_v13 = vmul.f32 %v1124_v10, %v588_v60  ;;  %v627_v14 = vmul.f32 %v1122_v59, %v626_v8  ;;  %vm639_vm14 = vweird.f32 %v1124_v10  ;;  %v751_v8 = vld [vmem:[%s1571_s3 + $0x38] sm:$0xff] }
 0x156   :  { %1125 = vrsqrt.f32 %v589_v12  ;;  %vm640_vm1 = vmor %vm638_vm15, %vm639_vm14  ;;  %vm648_vm3 = vweird.f32 %v589_v12 }
 0x157   :  { %v634_v16 = vmul.f32 %v1124_v10, %v633_v13  ;;  %v556_v18 = vpop.xlane.xlu2 %555  ;;  %v512_v19 = vpop.xlane.xlu1 %511  ;;  %v631_v20 = vsel %vm630_vm13, %v1122_v59, %v627_v14 }
 0x158   :  { %v566_v22 = vmul.f32 %v556_v18, %v1427_v47  ;;  %v1487_v23 = vmul.f32 %v1427_v47, %v512_v19  ;;  %v691_v26 = vmul.f32 %v683_v15, %v631_v20 }
 0x159   :  { %v635_v27 = vmul.f32 0.5, %v634_v16  ;;  %v559_v29 = vpop.xlane.xlu0 %558  ;;  %v750_v16 = vld [vmem:[%s1571_s3 + $0x30] sm:$0xff] }
 0x15a   :  { %v582_v30 = vsub.f32 %v566_v22, %v574_v21  ;;  %v575_v31 = vmul.f32 %v1487_v23, %v1487_v23  ;;  %v567_v32 = vmul.f32 %v559_v29, %v1427_v47  ;;  %713 = vperm.xlu2 %1111, %v691_v26   ;;  %v673_v26 = vsub.f32 %v1363_v34, %v1439_v58  ;;  %v816_v34 = vld [vmem:[%s1573_s4] sm:$0xff] }
 0x15b   :  { %v636_v33 = vsub.f32 1.5, %v635_v27 }
 0x15c   :  { %v1126_v35 = vpop.eup %1125  ;;  %v590_v36 = vadd.f32 1e-05, %v582_v30  ;;  %v583_v37 = vsub.f32 %v567_v32, %v575_v31  ;;  %v672_v32 = vsub.f32 %v1356_v24, %v1430_v49  ;;  %v675_v24 = vsub.f32 %v1377_v54, %v1454_v25 }
 0x15d   :  { %v643_v38 = vmul.f32 %v1126_v35, %v589_v12  ;;  %v637_v39 = vmul.f32 %v1124_v10, %v636_v33  ;;  %vm649_vm2 = vweird.f32 %v1126_v35  ;;  %v687_v12 = vld [vmem:[%s1572_s2 + $0x38] sm:$0xff] }
 0x15e   :  { %1127 = vrsqrt.f32 %v590_v36  ;;  %v591_v41 = vadd.f32 1e-05, %v583_v37  ;;  %vm650_vm4 = vmor %vm648_vm3, %vm649_vm2  ;;  %vm658_vm6 = vweird.f32 %v590_v36 }
 0x15f   :  { %v644_v42 = vmul.f32 %v1126_v35, %v643_v38  ;;  %v641_v45 = vsel %vm640_vm1, %v1124_v10, %v637_v39  ;;  %v760_v18 = vpop.permute.xlu2 %759  ;;  %v817_v38 = vld [vmem:[%s1573_s4 + $0x8] sm:$0xff] }
 0x160   :  { %1129 = vrsqrt.f32 %v591_v41  ;;  %v692_v47 = vmul.f32 %v684_v40, %v641_v45  ;;  %vm668_vm9 = vweird.f32 %v591_v41 }
 0x161   :  { %v645_v46 = vmul.f32 0.5, %v644_v42 }
 0x162   :  { %718 = vperm.xlu2 %1111, %v692_v47  }
 0x163   :  { %v646_v48 = vsub.f32 1.5, %v645_v46 }
 0x164   :  { %v1128_v50 = vpop.eup %1127 }
 0x165   :  { %v653_v51 = vmul.f32 %v1128_v50, %v590_v36  ;;  %v647_v52 = vmul.f32 %v1126_v35, %v646_v48  ;;  %vm659_vm5 = vweird.f32 %v1128_v50 }
 0x166   :  { %v1130_v55 = vpop.eup %1129  ;;  %vm660_vm8 = vmor %vm658_vm6, %vm659_vm5 }
 0x167   :  { %v654_v56 = vmul.f32 %v1128_v50, %v653_v51  ;;  %v663_v57 = vmul.f32 %v1130_v55, %v591_v41  ;;  %v651_v59 = vsel %vm650_vm4, %v1126_v35, %v647_v52  ;;  %vm669_vm7 = vweird.f32 %v1130_v55  ;;  %v775_v20 = vpop.permute.xlu2 %774 }
 0x168   :  { %v693_v60 = vmul.f32 %v685_v53, %v651_v59  ;;  %vm670_vm10 = vmor %vm668_vm9, %vm669_vm7  ;;  %v676_v51 = vsub.f32 %v1383_v63, %v1463_v43  ;;  %v818_v63 = vld [vmem:[%s1573_s4 + $0x10] sm:$0xff] }
 0x169   :  { %v655_v62 = vmul.f32 0.5, %v654_v56  ;;  %v664_v0 = vmul.f32 %v1130_v55, %v663_v57 }
 0x16a   :  { %723 = vperm.xlu0 %1112, %v693_v60  }
 0x16b   :  { %v656_v1 = vsub.f32 1.5, %v655_v62  ;;  %v665_v2 = vmul.f32 0.5, %v664_v0 }
 0x16c   :  { %v780_v40 = vpop.permute.xlu0 %779 }
 0x16d   :  { %v666_v3 = vsub.f32 1.5, %v665_v2  ;;  %v657_v5 = vmul.f32 %v1128_v50, %v656_v1  ;;  %v819_v1 = vld [vmem:[%s1573_s4 + $0x18] sm:$0xff] }
 0x16f   :  { %v661_v7 = vsel %vm660_vm8, %v1128_v50, %v657_v5  ;;  %v667_v10 = vmul.f32 %v1130_v55, %v666_v3  ;;  %v755_v19 = vpop.permute.xlu1 %754 }
 0x170   :  { %v694_v13 = vmul.f32 %v686_v6, %v661_v7 }
 0x171   :  { %v671_v14 = vsel %vm670_vm10, %v1130_v55, %v667_v10  ;;  %v674_v55 = vsub.f32 %v1370_v44, %v1445_v4  ;;  %v820_v44 = vld [vmem:[%s1573_s4 + $0x20] sm:$0xff] }
 0x172   :  { %728 = vperm.xlu1 %1110, %v694_v13   ;;  %789 = vperm.xlu0 %1112, %v751_v8   ;;  %v695_v15 = vmul.f32 %v687_v12, %v671_v14  ;;  %v1133_v13 = vmov 0.0  }
 0x173   :  { %858 = vst.msk [vmem:[%s1574_s5] sm:$0x1] %vm857_vm11, %v1133_v13 }
 0x174   :  { %733 = vperm.xlu2 %1111, %v695_v15   ;;  %v677_v15 = vsub.f32 %v1390_v9, %v1472_v61 }
 0x177   :  { %v765_v21 = vpop.permute.xlu1 %764 }
 0x17a   :  { %784 = vperm.xlu1 %1110, %v750_v16  }
 0x17f   :  { %v770_v27 = vpop.permute.xlu1 %769 }
 0x19e   :  { %v704_v22 = vpop.permute.xlu2 %703 }
 0x19f   :  { %v737_v29 = vmul.f32 %v704_v22, %v673_v26  ;;  %v821_v22 = vld [vmem:[%s1573_s4 + $0x28] sm:$0xff]  ;;  %v679_v26 = vsub.f32 %v1404_v28, %v1487_v23  ;;  %v823_v28 = vld [vmem:[%s1573_s4 + $0x38] sm:$0xff]  ;;  %v822_v23 = vld [vmem:[%s1573_s4 + $0x30] sm:$0xff] }
 0x1a1   :  { %v793_v30 = vadd.f32 %v760_v18, %v737_v29 }
 0x1a3   :  { %v801_v31 = vmul.f32 0.2, %v793_v30 }
 0x1a5   :  { %v809_v36 = vmax.f32 %v793_v30, %v801_v31 }
 0x1a7   :  { %v825_v41 = vmul.f32 %v817_v38, %v809_v36 }
 0x1a9   :  { %v833_v47 = vsel %vm488_vm0, %v825_v41, 0.0 }
 0x1ae   :  { %v699_v33 = vpop.permute.xlu1 %698 }
 0x1af   :  { %v736_v35 = vmul.f32 %v699_v33, %v672_v32 }
 0x1b1   :  { %v792_v37 = vadd.f32 %v755_v19, %v736_v35  ;;  %v678_v35 = vsub.f32 %v1397_v17, %v1478_v11 }
 0x1b3   :  { %v800_v39 = vmul.f32 0.2, %v792_v37 }
 0x1b4   :  { %v714_v58 = vpop.permute.xlu2 %713 }
 0x1b5   :  { %v808_v42 = vmax.f32 %v792_v37, %v800_v39  ;;  %v739_v45 = vmul.f32 %v714_v58, %v675_v24 }
 0x1b7   :  { %v824_v49 = vmul.f32 %v816_v34, %v808_v42  ;;  %v795_v50 = vadd.f32 %v770_v27, %v739_v45 }
 0x1b9   :  { %v832_v46 = vsel %vm488_vm0, %v824_v49, 0.0  ;;  %v803_v57 = vmul.f32 0.2, %v795_v50 }
 0x1ba   :  { %v834_v48 = vadd.f32 %v833_v47, %v832_v46 }
 0x1bb   :  { %v811_v62 = vmax.f32 %v795_v50, %v803_v57 }
 0x1bc   :  { %v719_v52 = vpop.permute.xlu2 %718 }
 0x1bd   :  { %v740_v53 = vmul.f32 %v719_v52, %v676_v51  ;;  %v827_v4 = vmul.f32 %v819_v1, %v811_v62  ;;  %v859_v51 = vld [vmem:[%s1574_s5] sm:$0x1] }
 0x1be   :  { %v709_v56 = vpop.permute.xlu0 %708 }
 0x1bf   :  { %v796_v59 = vadd.f32 %v775_v20, %v740_v53  ;;  %v738_v54 = vmul.f32 %v709_v56, %v674_v55  ;;  %v837_v8 = vsel %vm488_vm0, %v827_v4, 0.0 }
 0x1c1   :  { %v804_v25 = vmul.f32 0.2, %v796_v59  ;;  %v794_v60 = vadd.f32 %v765_v21, %v738_v54 }
 0x1c3   :  { %v802_v0 = vmul.f32 0.2, %v794_v60  ;;  %v812_v43 = vmax.f32 %v796_v59, %v804_v25 }
 0x1c5   :  { %v810_v2 = vmax.f32 %v794_v60, %v802_v0  ;;  %v828_v5 = vmul.f32 %v820_v44, %v812_v43 }
 0x1c7   :  { %v826_v3 = vmul.f32 %v818_v63, %v810_v2  ;;  %v839_v12 = vsel %vm488_vm0, %v828_v5, 0.0 }
 0x1c9   :  { %v835_v6 = vsel %vm488_vm0, %v826_v3, 0.0 }
 0x1ca   :  { %v836_v7 = vadd.f32 %v835_v6, %v834_v48 }
 0x1cc   :  { %v838_v10 = vadd.f32 %v837_v8, %v836_v7 }
 0x1ce   :  { %v840_v14 = vadd.f32 %v839_v12, %v838_v10  ;;  %v734_v21 = vpop.permute.xlu2 %733 }
 0x1cf   :  { %v743_v31 = vmul.f32 %v734_v21, %v679_v26 }
 0x1dc   :  { %v724_v16 = vpop.permute.xlu0 %723 }
 0x1dd   :  { %v741_v18 = vmul.f32 %v724_v16, %v677_v15 }
 0x1df   :  { %v797_v19 = vadd.f32 %v780_v40, %v741_v18 }
 0x1e1   :  { %v805_v20 = vmul.f32 0.2, %v797_v19 }
 0x1e3   :  { %v813_v27 = vmax.f32 %v797_v19, %v805_v20 }
 0x1e4   :  { %v729_v29 = vpop.permute.xlu1 %728  ;;  %v790_v30 = vpop.permute.xlu0 %789 }
 0x1e5   :  { %v829_v32 = vmul.f32 %v821_v22, %v813_v27  ;;  %v799_v9 = vadd.f32 %v790_v30, %v743_v31  ;;  %v742_v36 = vmul.f32 %v729_v29, %v678_v35 }
 0x1e7   :  { %v841_v33 = vsel %vm488_vm0, %v829_v32, 0.0  ;;  %v807_v37 = vmul.f32 0.2, %v799_v9 }
 0x1e8   :  { %v842_v61 = vadd.f32 %v841_v33, %v840_v14 }
 0x1e9   :  { %v815_v34 = vmax.f32 %v799_v9, %v807_v37 }
 0x1eb   :  { %v831_v41 = vmul.f32 %v823_v28, %v815_v34 }
 0x1ec   :  { %v785_v38 = vpop.permute.xlu1 %784 }
 0x1ed   :  { %v798_v39 = vadd.f32 %v785_v38, %v742_v36  ;;  %v845_v11 = vsel %vm488_vm0, %v831_v41, 0.0 }
 0x1ef   :  { %v806_v58 = vmul.f32 0.2, %v798_v39 }
 0x1f1   :  { %v814_v40 = vmax.f32 %v798_v39, %v806_v58 }
 0x1f3   :  { %v830_v42 = vmul.f32 %v822_v23, %v814_v40 }
 0x1f5   :  { %v843_v24 = vsel %vm488_vm0, %v830_v42, 0.0 }
 0x1f6   :  { %v844_v17 = vadd.f32 %v843_v24, %v842_v61 }
 0x1f8   :  { %v846_v49 = vadd.f32 %v845_v11, %v844_v17 }
 0x1fa   :  { %v847_v45 = vrot.slane %v846_v49, 4 }
 0x1fc   :  { %v848_v47 = vadd.f32 %v847_v45, %v846_v49 }
 0x1fe   :  { %v849_v46 = vrot.slane %v848_v47, 2 }
 0x200   :  { %v850_v48 = vadd.f32 %v849_v46, %v848_v47 }
 0x202   :  { %v851_v50 = vrot.slane %v850_v48, 1 }
 0x204   :  { %v852_v52 = vadd.f32 %v851_v50, %v850_v48 }
 0x206   :  { %v860_v53 = vadd.f32 %v859_v51, %v852_v52 }
 0x208   :  { %862 = vst.msk [vmem:[%s1574_s5] sm:$0x1] %vm857_vm11, %v860_v53 }

</bundles_post_ra>
